<compile_context>
chip_gen: v7x
topology: tpu7x:2x2x1
jax: 0.10.0
libtpu: 0.0.40
codegen_flags: <defaults>
</compile_context>

<pallas_src>
import functools

import jax
import jax.numpy as jnp
from jax.experimental import pallas as pl
from jax.experimental.pallas import tpu as pltpu

LANE = 128


def _round_up(x, m):
    return (x + m - 1) // m * m


def mlp_kernel(x_ref, w1_ref, b1_ref, w2_ref, b2_ref, o_ref):
    # x_ref:  (TB, K_pad)   bf16
    # w1_ref: (K_pad, H)    bf16      b1_ref: (1, H)      f32
    # w2_ref: (H, N_pad)    bf16      b2_ref: (1, N_pad)  f32
    # o_ref:  (TB, N_pad)   f32   (lane-dense padded output)
    h = jnp.dot(x_ref[...], w1_ref[...], preferred_element_type=jnp.float32)
    h = jnp.maximum(h + b1_ref[...], 0.0)                 # bias + ReLU in f32
    out = jnp.dot(h.astype(jnp.bfloat16), w2_ref[...],
                  preferred_element_type=jnp.float32)
    o_ref[...] = (out + b2_ref[...]).astype(o_ref.dtype)


def prepare_params(w1, b1, w2, b2):
    """One-time weight prep (do NOT redo per forward call).

    w1: (H, K) f32, b1: (H,), w2: (N, H), b2: (N,) -- PyTorch Linear layout.
    Returns weights transposed to (in, out), K padded to a 128 multiple,
    N padded to 128 lanes, matmul operands cast to bf16, biases kept f32.
    """
    hidden, input_dim = w1.shape
    num_classes = w2.shape[0]
    k_pad = _round_up(input_dim, LANE)   # 784 -> 896
    n_pad = _round_up(num_classes, LANE)  # 10  -> 128

    w1t = jnp.zeros((k_pad, hidden), jnp.float32).at[:input_dim, :].set(w1.T)
    w2t = jnp.zeros((hidden, n_pad), jnp.float32).at[:, :num_classes].set(w2.T)
    b1r = b1.reshape(1, hidden).astype(jnp.float32)
    b2r = jnp.zeros((1, n_pad), jnp.float32).at[:, :num_classes].set(b2)

    return dict(
        w1t=w1t.astype(jnp.bfloat16),
        b1r=b1r,
        w2t=w2t.astype(jnp.bfloat16),
        b2r=b2r,
        input_dim=input_dim,
        hidden=hidden,
        num_classes=num_classes,
        k_pad=k_pad,
        n_pad=n_pad,
    )


@functools.partial(jax.jit, static_argnames=("tile_b",))
def _mlp_forward_prepared(x, w1t, b1r, w2t, b2r, *, tile_b):
    B, input_dim = x.shape
    k_pad, hidden = w1t.shape
    n_pad = w2t.shape[1]

    # Right-size the batch tile for small B (keeps grid >= 1, sublane aligned),
    # then pad the batch up to a tile multiple instead of asserting divisibility.
    tile_b = min(tile_b, _round_up(B, LANE))
    b_pad = _round_up(B, tile_b)

    x_p = jnp.zeros((b_pad, k_pad), jnp.bfloat16)
    x_p = x_p.at[:B, :input_dim].set(x.astype(jnp.bfloat16))

    grid = (b_pad // tile_b,)
    out = pl.pallas_call(
        mlp_kernel,
        out_shape=jax.ShapeDtypeStruct((b_pad, n_pad), jnp.float32),
        grid_spec=pltpu.PrefetchScalarGridSpec(
            num_scalar_prefetch=0,
            grid=grid,
            in_specs=[
                pl.BlockSpec((tile_b, k_pad), lambda i: (i, 0)),   # streams per step
                pl.BlockSpec((k_pad, hidden), lambda i: (0, 0)),   # resident weights
                pl.BlockSpec((1, hidden), lambda i: (0, 0)),
                pl.BlockSpec((hidden, n_pad), lambda i: (0, 0)),
                pl.BlockSpec((1, n_pad), lambda i: (0, 0)),
            ],
            out_specs=pl.BlockSpec((tile_b, n_pad), lambda i: (i, 0)),
        ),
        compiler_params=pltpu.CompilerParams(
            dimension_semantics=("parallel",),   # shard batch tiles across TCs
            # ~4.5 MiB used at tile_b=1024 (2x bf16 x-block + 2x f32 out-block
            # + resident bf16 weights); cap leaves headroom even on v7x (64 MiB).
            vmem_limit_bytes=48 * 1024 * 1024,
        ),
    )(x_p, w1t, b1r, w2t, b2r)
    return out


def mlp_forward(x, params, *, tile_b=1024):
    """x: (B, input_dim) f32; params from prepare_params(). Returns (B, num_classes) f32."""
    out = _mlp_forward_prepared(
        x, params["w1t"], params["b1r"], params["w2t"], params["b2r"],
        tile_b=tile_b)
    return out[: x.shape[0], : params["num_classes"]]


def reference_forward(x, w1, b1, w2, b2):
    h = jnp.maximum(x @ w1.T + b1, 0.0)
    return h @ w2.T + b2


if __name__ == "__main__":
    # MNIST MLP shapes: input_dim = 28*28 = 784, hidden = 128, num_classes = 10.
    # B = 200 is intentionally NOT a tile multiple to exercise batch padding.
    B, INPUT_DIM, HIDDEN, NUM_CLASSES = 200, 784, 128, 10

    key = jax.random.PRNGKey(0)
    kx, kw1, kb1, kw2, kb2 = jax.random.split(key, 5)

    x = jax.random.normal(kx, (B, INPUT_DIM), dtype=jnp.float32)

    # Deterministic parameter init (PyTorch Linear-style uniform bounds).
    bound1 = 1.0 / (INPUT_DIM ** 0.5)
    w1 = jax.random.uniform(kw1, (HIDDEN, INPUT_DIM), jnp.float32, -bound1, bound1)
    b1 = jax.random.uniform(kb1, (HIDDEN,), jnp.float32, -bound1, bound1)
    bound2 = 1.0 / (HIDDEN ** 0.5)
    w2 = jax.random.uniform(kw2, (NUM_CLASSES, HIDDEN), jnp.float32, -bound2, bound2)
    b2 = jax.random.uniform(kb2, (NUM_CLASSES,), jnp.float32, -bound2, bound2)

    params = prepare_params(w1, b1, w2, b2)           # one-time setup
    out = mlp_forward(x, params, tile_b=1024)
    out = jax.block_until_ready(out)

    ref = reference_forward(x, w1, b1, w2, b2)        # f32 reference
    assert out.shape == (B, NUM_CLASSES)
    # bf16 matmul operands with f32 accumulation -> loosened tolerance.
    assert jnp.allclose(out, ref, atol=3e-2, rtol=3e-2)

    print("KERNEL_OK")
</pallas_src>

<mosaic_0001>
module attributes {stable_mosaic.version = 11 : i64} {
  func.func @mlp_kernel(%arg0: i32, %arg1: memref<256x896xbf16, #tpu.memory_space<vmem>>, %arg2: memref<896x128xbf16, #tpu.memory_space<vmem>>, %arg3: memref<1x128xf32, #tpu.memory_space<vmem>>, %arg4: memref<128x128xbf16, #tpu.memory_space<vmem>>, %arg5: memref<1x128xf32, #tpu.memory_space<vmem>>, %arg6: memref<256x128xf32, #tpu.memory_space<vmem>>) attributes {dimension_semantics = [#tpu.dimension_semantics<parallel>], iteration_bounds = array<i64: 1>, scalar_prefetch = 0 : i64, scratch_operands = 0 : i64, tpu.core_type = #tpu.core_type<tc>, window_params = [{transform_indices = @transform_0, window_bounds = array<i64: 256, 896>}, {pipeline_mode = #tpu.pipeline_mode<synchronous>, transform_indices = @transform_1, window_bounds = array<i64: 896, 128>}, {pipeline_mode = #tpu.pipeline_mode<synchronous>, transform_indices = @transform_2, window_bounds = array<i64: 1, 128>}, {pipeline_mode = #tpu.pipeline_mode<synchronous>, transform_indices = @transform_3, window_bounds = array<i64: 128, 128>}, {pipeline_mode = #tpu.pipeline_mode<synchronous>, transform_indices = @transform_4, window_bounds = array<i64: 1, 128>}, {transform_indices = @transform_5, window_bounds = array<i64: 256, 128>}]} {
    %c0 = arith.constant 0 : index
    %c0_0 = arith.constant 0 : index
    %0 = vector.load %arg1[%c0, %c0_0] : memref<256x896xbf16, #tpu.memory_space<vmem>>, vector<256x896xbf16>
    %c0_1 = arith.constant 0 : index
    %c0_2 = arith.constant 0 : index
    %1 = vector.load %arg2[%c0_1, %c0_2] : memref<896x128xbf16, #tpu.memory_space<vmem>>, vector<896x128xbf16>
    %cst = arith.constant dense<0.000000e+00> : vector<256x128xf32>
    %2 = tpu.matmul %0, %1, %cst {dimension_numbers = #tpu.dot_dimension_numbers<[1], [0], [0], [1], [0, 0, 1, 1], [], []>} : vector<256x896xbf16>, vector<896x128xbf16>, vector<256x128xf32> -> vector<256x128xf32>
    %c0_3 = arith.constant 0 : index
    %c0_4 = arith.constant 0 : index
    %3 = vector.load %arg3[%c0_3, %c0_4] : memref<1x128xf32, #tpu.memory_space<vmem>>, vector<1x128xf32>
    %4 = vector.broadcast %3 : vector<1x128xf32> to vector<256x128xf32>
    %5 = arith.addf %2, %4 : vector<256x128xf32>
    %cst_5 = arith.constant 0.000000e+00 : f32
    %6 = vector.broadcast %cst_5 : f32 to vector<256x128xf32>
    %7 = arith.maximumf %5, %6 : vector<256x128xf32>
    %8 = arith.truncf %7 : vector<256x128xf32> to vector<256x128xbf16>
    %c0_6 = arith.constant 0 : index
    %c0_7 = arith.constant 0 : index
    %9 = vector.load %arg4[%c0_6, %c0_7] : memref<128x128xbf16, #tpu.memory_space<vmem>>, vector<128x128xbf16>
    %cst_8 = arith.constant dense<0.000000e+00> : vector<256x128xf32>
    %10 = tpu.matmul %8, %9, %cst_8 {dimension_numbers = #tpu.dot_dimension_numbers<[1], [0], [0], [1], [0, 0, 1, 1], [], []>} : vector<256x128xbf16>, vector<128x128xbf16>, vector<256x128xf32> -> vector<256x128xf32>
    %c0_9 = arith.constant 0 : index
    %c0_10 = arith.constant 0 : index
    %11 = vector.load %arg5[%c0_9, %c0_10] : memref<1x128xf32, #tpu.memory_space<vmem>>, vector<1x128xf32>
    %12 = vector.broadcast %11 : vector<1x128xf32> to vector<256x128xf32>
    %13 = arith.addf %10, %12 : vector<256x128xf32>
    %c0_11 = arith.constant 0 : index
    %c0_12 = arith.constant 0 : index
    %14 = vector.load %arg6[%c0_11, %c0_12] : memref<256x128xf32, #tpu.memory_space<vmem>>, vector<256x128xf32>
    tpu.vector_store %arg6[%c0_11, %c0_12], %13 {strides = array<i32>} : memref<256x128xf32, #tpu.memory_space<vmem>>, vector<256x128xf32>,
    return
  }
  func.func @transform_0(%arg0: i32) -> (i32, i32) {
    %c0_i32 = arith.constant 0 : i32
    %c0_i32_0 = arith.constant 0 : i32
    return %arg0, %c0_i32 : i32, i32
  }
  func.func @transform_1(%arg0: i32) -> (i32, i32) {
    %c0_i32 = arith.constant 0 : i32
    %c0_i32_0 = arith.constant 0 : i32
    %c0_i32_1 = arith.constant 0 : i32
    return %c0_i32, %c0_i32_0 : i32, i32
  }
  func.func @transform_2(%arg0: i32) -> (i32, i32) {
    %c0_i32 = arith.constant 0 : i32
    %c0_i32_0 = arith.constant 0 : i32
    %c0_i32_1 = arith.constant 0 : i32
    return %c0_i32, %c0_i32_0 : i32, i32
  }
  func.func @transform_3(%arg0: i32) -> (i32, i32) {
    %c0_i32 = arith.constant 0 : i32
    %c0_i32_0 = arith.constant 0 : i32
    %c0_i32_1 = arith.constant 0 : i32
    return %c0_i32, %c0_i32_0 : i32, i32
  }
  func.func @transform_4(%arg0: i32) -> (i32, i32) {
    %c0_i32 = arith.constant 0 : i32
    %c0_i32_0 = arith.constant 0 : i32
    %c0_i32_1 = arith.constant 0 : i32
    return %c0_i32, %c0_i32_0 : i32, i32
  }
  func.func @transform_5(%arg0: i32) -> (i32, i32) {
    %c0_i32 = arith.constant 0 : i32
    %c0_i32_0 = arith.constant 0 : i32
    return %arg0, %c0_i32 : i32, i32
  }
}

</mosaic_0001>

<bundles_post_ra>
// kernel: _mlp_forward_prepared.1
= control target key start
LH: loop header
LB: loop body
LE: loop exit
PB: predicated region body
PF: predicated region fallthrough
CT: control target
= control target key end

     0   :  { %s3859_s0 = inlined_call_operand.vmem [shape: bf16[256,896], index: 0, kind: input, shape index: {}]   ;;  %s3860_s1 = inlined_call_operand.vmem [shape: bf16[896,128], index: 1, kind: input, shape index: {}]   ;;  %s3861_s2 = inlined_call_operand.vmem [shape: f32[1,128], index: 2, kind: input, shape index: {}]   ;;  %s3862_s3 = inlined_call_operand.vmem [shape: bf16[128,128], index: 3, kind: input, shape index: {}]   ;;  %s3863_s4 = inlined_call_operand.vmem [shape: f32[1,128], index: 4, kind: input, shape index: {}]   ;;  %s3864_s5 = inlined_call_operand.hbm [shape: f32[256,128], index: 5, kind: output, shape index: {}]  }
   0x1   :  { %v2814_v0 = vld [vmem:[%s3860_s1 + $0x40] sm:$0xff]   ;;  %v2818_v4 = vld [vmem:[%s3860_s1 + $0x48] sm:$0xff]   ;;  %v2822_v8 = vld [vmem:[%s3860_s1 + $0x50] sm:$0xff]  }
   0x2   :  { %v2815_v1 = vld [vmem:[%s3860_s1] sm:$0xff]   ;;  %2331 = vmatprep.subr.bf16.mxu0 %v2814_v0  ;;  %v2819_v5 = vld [vmem:[%s3860_s1 + $0x8] sm:$0xff]   ;;  %v2823_v9 = vld [vmem:[%s3860_s1 + $0x10] sm:$0xff]  }
   0x3   :  { %v2816_v2 = vld [vmem:[%s3860_s1 + $0xc0] sm:$0xff]   ;;  %2332 = vmatpush3.bf16.msra.mxu0 %v2815_v1  ;;  %v2820_v6 = vld [vmem:[%s3860_s1 + $0xc8] sm:$0xff]   ;;  %v2824_v10 = vld [vmem:[%s3860_s1 + $0xd0] sm:$0xff]  }
   0x4   :  { %v2817_v3 = vld [vmem:[%s3860_s1 + $0x80] sm:$0xff]   ;;  %2443 = vmatprep.subr.bf16.mxu1 %v2816_v2  ;;  %2333 = vmatprep.subr.bf16.mxu0 %v2818_v4  ;;  %v2821_v7 = vld [vmem:[%s3860_s1 + $0x88] sm:$0xff]   ;;  %v2825_v11 = vld [vmem:[%s3860_s1 + $0x90] sm:$0xff]  }
   0x5   :  { %2444 = vmatpush3.bf16.msra.mxu1 %v2817_v3  ;;  %v2826_v12 = vld [vmem:[%s3860_s1 + $0x58] sm:$0xff]   ;;  %v2830_v16 = vld [vmem:[%s3860_s1 + $0x60] sm:$0xff]   ;;  %v2834_v20 = vld [vmem:[%s3860_s1 + $0x68] sm:$0xff]  }
   0x6   :  { %2445 = vmatprep.subr.bf16.mxu1 %v2820_v6  ;;  %v2827_v13 = vld [vmem:[%s3860_s1 + $0x18] sm:$0xff]   ;;  %v2831_v17 = vld [vmem:[%s3860_s1 + $0x20] sm:$0xff]   ;;  %v2835_v21 = vld [vmem:[%s3860_s1 + $0x28] sm:$0xff]  }
   0x7   :  { %2334 = vmatpush3.bf16.msra.mxu0 %v2819_v5  ;;  %v2828_v14 = vld [vmem:[%s3860_s1 + $0xd8] sm:$0xff]   ;;  %v2832_v18 = vld [vmem:[%s3860_s1 + $0xe0] sm:$0xff]   ;;  %v2836_v22 = vld [vmem:[%s3860_s1 + $0xe8] sm:$0xff]  }
   0x8   :  { %2335 = vmatprep.subr.bf16.mxu0 %v2822_v8  ;;  %v2829_v15 = vld [vmem:[%s3860_s1 + $0x98] sm:$0xff]   ;;  %v2833_v19 = vld [vmem:[%s3860_s1 + $0xa0] sm:$0xff]   ;;  %v2837_v23 = vld [vmem:[%s3860_s1 + $0xa8] sm:$0xff]  }
   0x9   :  { %2446 = vmatpush3.bf16.msra.mxu1 %v2821_v7  ;;  %v2838_v24 = vld [vmem:[%s3860_s1 + $0x70] sm:$0xff]   ;;  %v2842_v28 = vld [vmem:[%s3860_s1 + $0x78] sm:$0xff]   ;;  %v2847_v32 = vld [vmem:[%s3859_s0 + $0x4] ss:$28 sps:$4 sm:$0xff]  }
   0xa   :  { %2447 = vmatprep.subr.bf16.mxu1 %v2824_v10  ;;  %v2839_v25 = vld [vmem:[%s3860_s1 + $0x30] sm:$0xff]   ;;  %v2843_v29 = vld [vmem:[%s3860_s1 + $0x38] sm:$0xff]   ;;  %1213 = vmatprep.mubr.bf16.mxu0 %v2847_v32  ;;  %v2849_v34 = vld [vmem:[%s3860_s1 + $0x140] sm:$0xff]  }
   0xb   :  { %2336 = vmatpush3.bf16.msra.mxu0 %v2823_v9  ;;  %v2840_v26 = vld [vmem:[%s3860_s1 + $0xf0] sm:$0xff]   ;;  %v2844_v30 = vld [vmem:[%s3860_s1 + $0xf8] sm:$0xff]   ;;  %v2850_v35 = vld [vmem:[%s3859_s0 + $0x8] ss:$28 sps:$4 sm:$0xff]  }
   0xc   :  { %2337 = vmatprep.subr.bf16.mxu0 %v2826_v12  ;;  %v2841_v27 = vld [vmem:[%s3860_s1 + $0xb0] sm:$0xff]   ;;  %v2845_v31 = vld [vmem:[%s3859_s0] ss:$28 sps:$4 sm:$0xff]   ;;  %v2852_v36 = vld [vmem:[%s3859_s0 + $0xc] ss:$28 sps:$4 sm:$0xff]  }
   0xd   :  { %2448 = vmatpush3.bf16.msra.mxu1 %v2825_v11  ;;  %v2848_v33 = vld [vmem:[%s3860_s1 + $0xb8] sm:$0xff]   ;;  %v2853_v37 = vld [vmem:[%s3860_s1 + $0x100] sm:$0xff]   ;;  %1374 = vmatprep.mubr.bf16.mxu1 %v2852_v36  ;;  %v2860_v41 = vld [vmem:[%s3859_s0 + $0x74] ss:$28 sps:$4 sm:$0xff]  }
   0xe   :  { %2449 = vmatprep.subr.bf16.mxu1 %v2828_v14  ;;  %v2854_v38 = vld [vmem:[%s3859_s0 + $0x3c] ss:$28 sps:$4 sm:$0xff]   ;;  %v2857_v39 = vld [vmem:[%s3859_s0 + $0x44] ss:$28 sps:$4 sm:$0xff]   ;;  %v2863_v42 = vld [vmem:[%s3860_s1 + $0x148] sm:$0xff]  }
   0xf   :  { %2338 = vmatpush3.bf16.msra.mxu0 %v2827_v13  ;;  %v2856_v40 = vld [vmem:[%s3859_s0 + $0x38] ss:$28 sps:$4 sm:$0xff]   ;;  %v2859_v43 = vld [vmem:[%s3859_s0 + $0x40] ss:$28 sps:$4 sm:$0xff]   ;;  %v2866_v45 = vld [vmem:[%s3860_s1 + $0x108] sm:$0xff]  }
  0x10   :  { %2339 = vmatprep.subr.bf16.mxu0 %v2830_v16  ;;  %v2864_v44 = vld [vmem:[%s3859_s0 + $0x7c] ss:$28 sps:$4 sm:$0xff]   ;;  %v2862_v46 = vld [vmem:[%s3859_s0 + $0x70] ss:$28 sps:$4 sm:$0xff]   ;;  %v2870_v52 = vld [vmem:[%s3859_s0 + $0xa8] ss:$28 sps:$4 sm:$0xff]  }
  0x11   :  { %2450 = vmatpush3.bf16.msra.mxu1 %v2829_v15  ;;  %v2868_v47 = vld [vmem:[%s3859_s0 + $0xac] ss:$28 sps:$4 sm:$0xff]   ;;  %v2877_v48 = vld [vmem:[%s3860_s1 + $0x150] sm:$0xff]   ;;  %v2874_v53 = vld [vmem:[%s3859_s0 + $0xe4] ss:$28 sps:$4 sm:$0xff]  }
  0x12   :  { %2451 = vmatprep.subr.bf16.mxu1 %v2832_v18  ;;  %v2867_v49 = vld [vmem:[%s3859_s0 + $0x78] ss:$28 sps:$4 sm:$0xff]   ;;  %v2873_v55 = vld [vmem:[%s3859_s0 + $0xb0] ss:$28 sps:$4 sm:$0xff]   ;;  %v2876_v58 = vld [vmem:[%s3859_s0 + $0xe0] ss:$28 sps:$4 sm:$0xff]  }
  0x13   :  { %2340 = vmatpush3.bf16.msra.mxu0 %v2831_v17  ;;  %v2880_v50 = vld [vmem:[%s3860_s1 + $0x110] sm:$0xff]   ;;  %v2891_v54 = vld [vmem:[%s3860_s1 + $0x158] sm:$0xff]   ;;  %v2878_v57 = vld [vmem:[%s3859_s0 + $0xec] ss:$28 sps:$4 sm:$0xff]  }
  0x14   :  { %2341 = vmatprep.subr.bf16.mxu0 %v2834_v20  ;;  %v2871_v51 = vld [vmem:[%s3859_s0 + $0xb4] ss:$28 sps:$4 sm:$0xff]   ;;  %v2894_v56 = vld [vmem:[%s3860_s1 + $0x118] sm:$0xff]   ;;  %v2905_v59 = vld [vmem:[%s3860_s1 + $0x160] sm:$0xff]  }
  0x15   :  { %2452 = vmatpush3.bf16.msra.mxu1 %v2833_v19  ;;  %v2882_v60 = vld [vmem:[%s3859_s0 + $0x11c] ss:$28 sps:$4 sm:$0xff]   ;;  %v2881_v61 = vld [vmem:[%s3859_s0 + $0xe8] ss:$28 sps:$4 sm:$0xff]   ;;  %v2888_v4 = vld [vmem:[%s3859_s0 + $0x154] ss:$28 sps:$4 sm:$0xff]  }
  0x16   :  { %2453 = vmatprep.subr.bf16.mxu1 %v2836_v22  ;;  %v2908_v62 = vld [vmem:[%s3860_s1 + $0x120] sm:$0xff]   ;;  %v2884_v1 = vld [vmem:[%s3859_s0 + $0x118] ss:$28 sps:$4 sm:$0xff]   ;;  %v2920_v2 = vld [vmem:[%s3860_s1 + $0x168] sm:$0xff]  }
  0x17   :  { %2342 = vmatpush3.bf16.msra.mxu0 %v2835_v21  ;;  %v2910_v63 = vld [vmem:[%s3860_s1 + $0x180] sm:$0xff]   ;;  %v2923_v5 = vld [vmem:[%s3860_s1 + $0x128] sm:$0xff]   ;;  %v2892_v6 = vld [vmem:[%s3859_s0 + $0x15c] ss:$28 sps:$4 sm:$0xff]  }
  0x18   :  { %2343 = vmatprep.subr.bf16.mxu0 %v2838_v24  ;;  %v2885_v0 = vld [vmem:[%s3859_s0 + $0x124] ss:$28 sps:$4 sm:$0xff]   ;;  %v2925_v7 = vld [vmem:[%s3860_s1 + $0x188] sm:$0xff]   ;;  %v2935_v10 = vld [vmem:[%s3860_s1 + $0x170] sm:$0xff]  }
  0x19   :  { %2454 = vmatpush3.bf16.msra.mxu1 %v2837_v23  ;;  %v2887_v3 = vld [vmem:[%s3859_s0 + $0x120] ss:$28 sps:$4 sm:$0xff]   ;;  %v2890_v8 = vld [vmem:[%s3859_s0 + $0x150] ss:$28 sps:$4 sm:$0xff]   ;;  %v2895_v11 = vld [vmem:[%s3859_s0 + $0x158] ss:$28 sps:$4 sm:$0xff]  }
  0x1a   :  { %2455 = vmatprep.subr.bf16.mxu1 %v2840_v26  ;;  %v2896_v9 = vld [vmem:[%s3859_s0 + $0x18c] ss:$28 sps:$4 sm:$0xff]   ;;  %v2899_v12 = vld [vmem:[%s3859_s0 + $0x194] ss:$28 sps:$4 sm:$0xff]   ;;  %v2902_v16 = vld [vmem:[%s3859_s0 + $0x1c4] ss:$28 sps:$4 sm:$0xff]  }
  0x1b   :  { %2344 = vmatpush3.bf16.msra.mxu0 %v2839_v25  ;;  %v2938_v13 = vld [vmem:[%s3860_s1 + $0x130] sm:$0xff]   ;;  %v2898_v15 = vld [vmem:[%s3859_s0 + $0x188] ss:$28 sps:$4 sm:$0xff]   ;;  %v2950_v17 = vld [vmem:[%s3860_s1 + $0x178] sm:$0xff]  }
  0x1c   :  { %2345 = vmatprep.subr.bf16.mxu0 %v2842_v28  ;;  %v2940_v14 = vld [vmem:[%s3860_s1 + $0x190] sm:$0xff]   ;;  %v2951_v18 = vld [vmem:[%s3860_s1 + $0x198] sm:$0xff]   ;;  %v2906_v20 = vld [vmem:[%s3859_s0 + $0x1cc] ss:$28 sps:$4 sm:$0xff]  }
  0x1d   :  { %2456 = vmatpush3.bf16.msra.mxu1 %v2841_v27  ;;  %v2901_v19 = vld [vmem:[%s3859_s0 + $0x190] ss:$28 sps:$4 sm:$0xff]   ;;  %v2954_v21 = vld [vmem:[%s3860_s1 + $0x138] sm:$0xff]   ;;  %v2956_v22 = vld [vmem:[%s3860_s1 + $0x1a0] sm:$0xff]  }
  0x1e   :  { %2457 = vmatprep.subr.bf16.mxu1 %v2844_v30  ;;  %v2904_v23 = vld [vmem:[%s3859_s0 + $0x1c0] ss:$28 sps:$4 sm:$0xff]   ;;  %v2960_v24 = vld [vmem:[%s3860_s1 + $0x1a8] sm:$0xff]   ;;  %v2964_v26 = vld [vmem:[%s3860_s1 + $0x1b0] sm:$0xff]  }
  0x1f   :  { %2346 = vmatpush3.bf16.msra.mxu0 %v2843_v29  ;;  %v2911_v25 = vld [vmem:[%s3859_s0 + $0x1fc] ss:$28 sps:$4 sm:$0xff]   ;;  %v2909_v27 = vld [vmem:[%s3859_s0 + $0x1c8] ss:$28 sps:$4 sm:$0xff]  }
  0x20   :  { %2555 = vmatprep.subr.bf16.mxu0 %v2849_v34  ;;  %v2914_v28 = vld [vmem:[%s3859_s0 + $0x204] ss:$28 sps:$4 sm:$0xff]   ;;  %v2968_v29 = vld [vmem:[%s3860_s1 + $0x1b8] sm:$0xff]   ;;  %v2919_v34 = vld [vmem:[%s3859_s0 + $0x230] ss:$28 sps:$4 sm:$0xff]  }
  0x21   :  { %2458 = vmatpush3.bf16.msra.mxu1 %v2848_v33  ;;  %v2913_v30 = vld [vmem:[%s3859_s0 + $0x1f8] ss:$28 sps:$4 sm:$0xff]   ;;  %v2916_v32 = vld [vmem:[%s3859_s0 + $0x200] ss:$28 sps:$4 sm:$0xff]  }
  0x22   :  { %1214 = vmatmul.mubr.bf16.vlgmr.msra.gmra.mrb[0].mxu0 %v2845_v31  ;;  %2715 = vmatprep.subr.bf16.mxu1 %v2910_v63  ;;  %v2917_v31 = vld [vmem:[%s3859_s0 + $0x234] ss:$28 sps:$4 sm:$0xff]   ;;  %v2921_v33 = vld [vmem:[%s3859_s0 + $0x23c] ss:$28 sps:$4 sm:$0xff]  }
  0x23   :  { %2556 = vmatpush3.bf16.msra.mxu0 %v2853_v37  ;;  %1221 = vmatprep.mubr.bf16.mxu0 %v2854_v38  ;;  %v2924_v36 = vld [vmem:[%s3859_s0 + $0x238] ss:$28 sps:$4 sm:$0xff]   ;;  %v2928_v38 = vld [vmem:[%s3859_s0 + $0x268] ss:$28 sps:$4 sm:$0xff]  }
  0x24   :  { %1375 = vmatmul.mubr.bf16.vlgmr.msra.gmra.mrb[0].mxu1 %v2850_v35  ;;  %2557 = vmatprep.subr.bf16.mxu0 %v2863_v42  ;;  %v2926_v35 = vld [vmem:[%s3859_s0 + $0x26c] ss:$28 sps:$4 sm:$0xff]   ;;  %v2929_v37 = vld [vmem:[%s3859_s0 + $0x274] ss:$28 sps:$4 sm:$0xff]   ;;  %v2934_v42 = vld [vmem:[%s3859_s0 + $0x2a0] ss:$28 sps:$4 sm:$0xff]  }
  0x25   :  { %1382 = vmatprep.mubr.bf16.mxu1 %v2857_v39  ;;  %2716 = vmatpush3.bf16.msra.mxu1 %v2910_v63  ;;  %v2932_v39 = vld [vmem:[%s3859_s0 + $0x2a4] ss:$28 sps:$4 sm:$0xff]  }
  0x26   :  { %2717 = vmatprep.subr.bf16.mxu1 %v2925_v7 }
  0x27   :  { %2558 = vmatpush3.bf16.msra.mxu0 %v2866_v45  ;;  %v2944_v45 = vld [vmem:[%s3859_s0 + $0x2e4] ss:$28 sps:$4 sm:$0xff]  }
  0x28   :  { %2559 = vmatprep.subr.bf16.mxu0 %v2877_v48  ;;  %v2946_v48 = vld [vmem:[%s3859_s0 + $0x2e0] ss:$28 sps:$4 sm:$0xff]  }
  0x29   :  { %2718 = vmatpush3.bf16.msra.mxu1 %v2925_v7 }
  0x2a   :  { %1222 = vmatmul.mubr.bf16.gmra.mrb[4].mxu0 %v2856_v40  ;;  %2719 = vmatprep.subr.bf16.mxu1 %v2940_v14  ;;  %v2931_v40 = vld [vmem:[%s3859_s0 + $0x270] ss:$28 sps:$4 sm:$0xff]  }
  0x2b   :  { %1229 = vmatprep.mubr.bf16.mxu0 %v2860_v41  ;;  %2560 = vmatpush3.bf16.msra.mxu0 %v2880_v50  ;;  %v2936_v41 = vld [vmem:[%s3859_s0 + $0x2ac] ss:$28 sps:$4 sm:$0xff]  }
  0x2c   :  { %1383 = vmatmul.mubr.bf16.gmra.mrb[4].mxu1 %v2859_v43  ;;  %2561 = vmatprep.subr.bf16.mxu0 %v2891_v54  ;;  %v2941_v43 = vld [vmem:[%s3859_s0 + $0x2dc] ss:$28 sps:$4 sm:$0xff]  }
  0x2d   :  { %1390 = vmatprep.mubr.bf16.mxu1 %v2864_v44  ;;  %2720 = vmatpush3.bf16.msra.mxu1 %v2940_v14  ;;  %v2939_v44 = vld [vmem:[%s3859_s0 + $0x2a8] ss:$28 sps:$4 sm:$0xff]  }
  0x2e   :  { %2721 = vmatprep.subr.bf16.mxu1 %v2951_v18 }
  0x2f   :  { %2562 = vmatpush3.bf16.msra.mxu0 %v2894_v56 }
  0x30   :  { %2563 = vmatprep.subr.bf16.mxu0 %v2905_v59 }
  0x31   :  { %2722 = vmatpush3.bf16.msra.mxu1 %v2951_v18 }
  0x32   :  { %1230 = vmatmul.mubr.bf16.gmra.mrb[8].mxu0 %v2862_v46  ;;  %2723 = vmatprep.subr.bf16.mxu1 %v2956_v22  ;;  %v2943_v46 = vld [vmem:[%s3859_s0 + $0x2d8] ss:$28 sps:$4 sm:$0xff]  }
  0x33   :  { %1237 = vmatprep.mubr.bf16.mxu0 %v2868_v47  ;;  %2564 = vmatpush3.bf16.msra.mxu0 %v2908_v62  ;;  %v2947_v47 = vld [vmem:[%s3859_s0 + $0x314] ss:$28 sps:$4 sm:$0xff]  }
  0x34   :  { %1391 = vmatmul.mubr.bf16.gmra.mrb[8].mxu1 %v2867_v49  ;;  %2565 = vmatprep.subr.bf16.mxu0 %v2920_v2  ;;  %v2952_v49 = vld [vmem:[%s3859_s0 + $0x31c] ss:$28 sps:$4 sm:$0xff]  }
  0x35   :  { %1398 = vmatprep.mubr.bf16.mxu1 %v2871_v51  ;;  %2724 = vmatpush3.bf16.msra.mxu1 %v2956_v22 }
  0x36   :  { %2725 = vmatprep.subr.bf16.mxu1 %v2960_v24 }
  0x37   :  { %2566 = vmatpush3.bf16.msra.mxu0 %v2923_v5 }
  0x38   :  { %2567 = vmatprep.subr.bf16.mxu0 %v2935_v10 }
  0x39   :  { %2726 = vmatpush3.bf16.msra.mxu1 %v2960_v24 }
  0x3a   :  { %1238 = vmatmul.mubr.bf16.gmra.mrb[12].mxu0 %v2870_v52  ;;  %2727 = vmatprep.subr.bf16.mxu1 %v2964_v26 }
  0x3b   :  { %1245 = vmatprep.mubr.bf16.mxu0 %v2874_v53  ;;  %2568 = vmatpush3.bf16.msra.mxu0 %v2938_v13 }
  0x3c   :  { %1399 = vmatmul.mubr.bf16.gmra.mrb[12].mxu1 %v2873_v55  ;;  %2569 = vmatprep.subr.bf16.mxu0 %v2950_v17 }
  0x3d   :  { %1406 = vmatprep.mubr.bf16.mxu1 %v2878_v57  ;;  %2728 = vmatpush3.bf16.msra.mxu1 %v2964_v26 }
  0x3e   :  { %2729 = vmatprep.subr.bf16.mxu1 %v2968_v29 }
  0x3f   :  { %2570 = vmatpush3.bf16.msra.mxu0 %v2954_v21 }
  0x41   :  { %2730 = vmatpush3.bf16.msra.mxu1 %v2968_v29 }
  0x42   :  { %1246 = vmatmul.mubr.bf16.gmra.mrb[16].mxu0 %v2876_v58 }
  0x43   :  { %1253 = vmatprep.mubr.bf16.mxu0 %v2882_v60 }
  0x44   :  { %1407 = vmatmul.mubr.bf16.gmra.mrb[16].mxu1 %v2881_v61 }
  0x45   :  { %1414 = vmatprep.mubr.bf16.mxu1 %v2885_v0 }
  0x4a   :  { %1254 = vmatmul.mubr.bf16.gmra.mrb[20].mxu0 %v2884_v1 }
  0x4b   :  { %1261 = vmatprep.mubr.bf16.mxu0 %v2888_v4 }
  0x4c   :  { %1415 = vmatmul.mubr.bf16.gmra.mrb[20].mxu1 %v2887_v3 }
  0x4d   :  { %1422 = vmatprep.mubr.bf16.mxu1 %v2892_v6 }
  0x52   :  { %1262 = vmatmul.mubr.bf16.gmra.mrb[24].mxu0 %v2890_v8 }
  0x53   :  { %1269 = vmatprep.mubr.bf16.mxu0 %v2896_v9 }
  0x54   :  { %1423 = vmatmul.mubr.bf16.gmra.mrb[24].mxu1 %v2895_v11 }
  0x55   :  { %1430 = vmatprep.mubr.bf16.mxu1 %v2899_v12 }
  0x5a   :  { %1270 = vmatmul.mubr.bf16.gmra.mrb[28].mxu0 %v2898_v15 }
  0x5b   :  { %1277 = vmatprep.mubr.bf16.mxu0 %v2902_v16 }
  0x5c   :  { %1431 = vmatmul.mubr.bf16.gmra.mrb[28].mxu1 %v2901_v19 }
  0x5d   :  { %1438 = vmatprep.mubr.bf16.mxu1 %v2906_v20 }
  0x62   :  { %1278 = vmatmul.mubr.bf16.gmra.mrb[32].mxu0 %v2904_v23 }
  0x63   :  { %1285 = vmatprep.mubr.bf16.mxu0 %v2911_v25 }
  0x64   :  { %1439 = vmatmul.mubr.bf16.gmra.mrb[32].mxu1 %v2909_v27 }
  0x65   :  { %1446 = vmatprep.mubr.bf16.mxu1 %v2914_v28 }
  0x6a   :  { %1286 = vmatmul.mubr.bf16.gmra.mrb[36].mxu0 %v2913_v30 }
  0x6b   :  { %1293 = vmatprep.mubr.bf16.mxu0 %v2917_v31 }
  0x6c   :  { %1447 = vmatmul.mubr.bf16.gmra.mrb[36].mxu1 %v2916_v32 }
  0x6d   :  { %1454 = vmatprep.mubr.bf16.mxu1 %v2921_v33 }
  0x72   :  { %1294 = vmatmul.mubr.bf16.gmra.mrb[40].mxu0 %v2919_v34 }
  0x73   :  { %1301 = vmatprep.mubr.bf16.mxu0 %v2926_v35 }
  0x74   :  { %1455 = vmatmul.mubr.bf16.gmra.mrb[40].mxu1 %v2924_v36 }
  0x75   :  { %1462 = vmatprep.mubr.bf16.mxu1 %v2929_v37 }
  0x7a   :  { %1302 = vmatmul.mubr.bf16.gmra.mrb[44].mxu0 %v2928_v38 }
  0x7b   :  { %1309 = vmatprep.mubr.bf16.mxu0 %v2932_v39 }
  0x7c   :  { %1463 = vmatmul.mubr.bf16.gmra.mrb[44].mxu1 %v2931_v40 }
  0x7d   :  { %1470 = vmatprep.mubr.bf16.mxu1 %v2936_v41 }
  0x82   :  { %1310 = vmatmul.mubr.bf16.gmra.mrb[48].mxu0 %v2934_v42 }
  0x83   :  { %1317 = vmatprep.mubr.bf16.mxu0 %v2941_v43 }
  0x84   :  { %1471 = vmatmul.mubr.bf16.gmra.mrb[48].mxu1 %v2939_v44 }
  0x85   :  { %1478 = vmatprep.mubr.bf16.mxu1 %v2944_v45 }
  0x8a   :  { %1318 = vmatmul.mubr.bf16.gmra.mrb[52].mxu0 %v2943_v46 }
  0x8b   :  { %10 = vsyncpa [#allocation3], 0  ;;  %1325 = vmatprep.mubr.bf16.mxu0 %v2947_v47  ;;  %v2949_v50 = vld [vmem:[%s3859_s0 + $0x310] ss:$28 sps:$4 sm:$0xff]   ;;  %v2955_v52 = vld [vmem:[%s3859_s0 + $0x318] ss:$28 sps:$4 sm:$0xff]  }
  0x8c   :  { %1479 = vmatmul.mubr.bf16.gmra.mrb[52].mxu1 %v2946_v48  ;;  %v2957_v51 = vld [vmem:[%s3859_s0 + $0x34c] ss:$28 sps:$4 sm:$0xff]   ;;  %v2961_v53 = vld [vmem:[%s3859_s0 + $0x354] ss:$28 sps:$4 sm:$0xff]   ;;  %v2974_v63 = vld [vmem:[%s3859_s0 + $0x84] ss:$28 sps:$4 sm:$0xff]  }
  0x8d   :  { %1486 = vmatprep.mubr.bf16.mxu1 %v2952_v49  ;;  %v2959_v54 = vld [vmem:[%s3859_s0 + $0x348] ss:$28 sps:$4 sm:$0xff]   ;;  %v2967_v55 = vld [vmem:[%s3859_s0 + $0x14] ss:$28 sps:$4 sm:$0xff]   ;;  %v2978_v0 = vld [vmem:[%s3859_s0 + $0xc0] ss:$28 sps:$4 sm:$0xff]  }
  0x8e   :  { %v2963_v56 = vld [vmem:[%s3859_s0 + $0x350] ss:$28 sps:$4 sm:$0xff]   ;;  %v2969_v57 = vld [vmem:[%s3859_s0 + $0x18] ss:$28 sps:$4 sm:$0xff]   ;;  %v2977_v61 = vld [vmem:[%s3859_s0 + $0x88] ss:$28 sps:$4 sm:$0xff]  }
  0x8f   :  { %v2965_v58 = vld [vmem:[%s3859_s0 + $0x10] ss:$28 sps:$4 sm:$0xff]   ;;  %v2973_v62 = vld [vmem:[%s3859_s0 + $0x48] ss:$28 sps:$4 sm:$0xff]   ;;  %v2985_v1 = vld [vmem:[%s3859_s0 + $0xf8] ss:$28 sps:$4 sm:$0xff]  }
  0x90   :  { %v2971_v59 = vld [vmem:[%s3859_s0 + $0x4c] ss:$28 sps:$4 sm:$0xff]   ;;  %v2976_v2 = vld [vmem:[%s3859_s0 + $0x80] ss:$28 sps:$4 sm:$0xff]   ;;  %v2981_v6 = vld [vmem:[%s3859_s0 + $0xb8] ss:$28 sps:$4 sm:$0xff]  }
  0x91   :  { %v2970_v60 = vld [vmem:[%s3859_s0 + $0x50] ss:$28 sps:$4 sm:$0xff]   ;;  %v2979_v3 = vld [vmem:[%s3859_s0 + $0xbc] ss:$28 sps:$4 sm:$0xff]   ;;  %v2993_v5 = vld [vmem:[%s3859_s0 + $0x168] ss:$28 sps:$4 sm:$0xff]  }
  0x92   :  { %1326 = vmatmul.mubr.bf16.gmra.mrb[56].mxu0 %v2949_v50  ;;  %v2986_v4 = vld [vmem:[%s3859_s0 + $0x130] ss:$28 sps:$4 sm:$0xff]   ;;  %v2994_v8 = vld [vmem:[%s3859_s0 + $0x1a0] ss:$28 sps:$4 sm:$0xff]   ;;  %v3001_v9 = vld [vmem:[%s3859_s0 + $0x1d8] ss:$28 sps:$4 sm:$0xff]  }
  0x93   :  { %1333 = vmatprep.mubr.bf16.mxu0 %v2957_v51  ;;  %v2982_v7 = vld [vmem:[%s3859_s0 + $0xf4] ss:$28 sps:$4 sm:$0xff]   ;;  %v2987_v11 = vld [vmem:[%s3859_s0 + $0x12c] ss:$28 sps:$4 sm:$0xff]   ;;  %v2990_v15 = vld [vmem:[%s3859_s0 + $0x164] ss:$28 sps:$4 sm:$0xff]  }
  0x94   :  { %1487 = vmatmul.mubr.bf16.gmra.mrb[56].mxu1 %v2955_v52  ;;  %v2984_v10 = vld [vmem:[%s3859_s0 + $0xf0] ss:$28 sps:$4 sm:$0xff]   ;;  %v3009_v13 = vld [vmem:[%s3859_s0 + $0x248] ss:$28 sps:$4 sm:$0xff]   ;;  %v3010_v16 = vld [vmem:[%s3859_s0 + $0x280] ss:$28 sps:$4 sm:$0xff]  }
  0x95   :  { %1494 = vmatprep.mubr.bf16.mxu1 %v2961_v53  ;;  %v3002_v12 = vld [vmem:[%s3859_s0 + $0x210] ss:$28 sps:$4 sm:$0xff]   ;;  %v2989_v14 = vld [vmem:[%s3859_s0 + $0x128] ss:$28 sps:$4 sm:$0xff]   ;;  %v3017_v17 = vld [vmem:[%s3859_s0 + $0x2b8] ss:$28 sps:$4 sm:$0xff]  }
  0x96   :  { %v2992_v18 = vld [vmem:[%s3859_s0 + $0x160] ss:$28 sps:$4 sm:$0xff]   ;;  %v3018_v20 = vld [vmem:[%s3859_s0 + $0x2f0] ss:$28 sps:$4 sm:$0xff]   ;;  %v3025_v21 = vld [vmem:[%s3859_s0 + $0x328] ss:$28 sps:$4 sm:$0xff]  }
  0x97   :  { %v2995_v19 = vld [vmem:[%s3859_s0 + $0x19c] ss:$28 sps:$4 sm:$0xff]   ;;  %v2998_v23 = vld [vmem:[%s3859_s0 + $0x1d4] ss:$28 sps:$4 sm:$0xff]   ;;  %v3003_v26 = vld [vmem:[%s3859_s0 + $0x20c] ss:$28 sps:$4 sm:$0xff]  }
  0x98   :  { %v2997_v22 = vld [vmem:[%s3859_s0 + $0x198] ss:$28 sps:$4 sm:$0xff]   ;;  %v3026_v24 = vld [vmem:[%s3859_s0 + $0x360] ss:$28 sps:$4 sm:$0xff]   ;;  %v3000_v25 = vld [vmem:[%s3859_s0 + $0x1d0] ss:$28 sps:$4 sm:$0xff]  }
  0x99   :  { %v3005_v27 = vld [vmem:[%s3859_s0 + $0x208] ss:$28 sps:$4 sm:$0xff]   ;;  %v3008_v30 = vld [vmem:[%s3859_s0 + $0x240] ss:$28 sps:$4 sm:$0xff]   ;;  %v3032_v33 = vld [vmem:[%s3862_s3 + $0x10] sm:$0xff]  }
  0x9a   :  { %1334 = vmatmul.mubr.bf16.gmra.mrb[60].mxu0 %v2959_v54  ;;  %v3006_v28 = vld [vmem:[%s3859_s0 + $0x244] ss:$28 sps:$4 sm:$0xff]   ;;  %v3031_v31 = vld [vmem:[%s3862_s3 + $0x8] sm:$0xff]   ;;  %v3011_v32 = vld [vmem:[%s3859_s0 + $0x27c] ss:$28 sps:$4 sm:$0xff]  }
  0x9b   :  { %1535 = vmatprep.mubr.bf16.mxu0 %v2967_v55  ;;  %v3030_v29 = vld [vmem:[%s3862_s3] sm:$0xff]   ;;  %v3013_v37 = vld [vmem:[%s3859_s0 + $0x278] ss:$28 sps:$4 sm:$0xff]  }
  0x9c   :  { %1495 = vmatmul.mubr.bf16.gmra.mrb[60].mxu1 %v2963_v56  ;;  %2763 = vmatprep.subr.bf16.mxu1 %v3030_v29  ;;  %v3584_v35 = vld [vmem:[%s3861_s2] ss:$0 sm:$0xff]  ;;  %v3033_v38 = vld [vmem:[%s3862_s3 + $0x18] sm:$0xff]   ;;  %v3014_v41 = vld [vmem:[%s3859_s0 + $0x2b4] ss:$28 sps:$4 sm:$0xff]  }
  0x9d   :  { %2731 = vmatprep.mubr.bf16.mxu1 %v2969_v57  ;;  %v3034_v49 = vld [vmem:[%s3862_s3 + $0x20] sm:$0xff]   ;;  %v3016_v57 = vld [vmem:[%s3859_s0 + $0x2b0] ss:$28 sps:$4 sm:$0xff]  }
  0xa2   :  { %1536 = vmatmul.mubr.bf16.vlgmr.msra.gmra.mrb[64].mxu0 %v2965_v58  ;;  %v3035_v58 = vld [vmem:[%s3862_s3 + $0x28] sm:$0xff]  }
  0xa3   :  { %1543 = vmatprep.mubr.bf16.mxu0 %v2971_v59 }
  0xa4   :  { %2732 = vmatmul.mubr.bf16.vlgmr.msra.gmra.mrb[64].mxu1 %v2970_v60 }
  0xa5   :  { %2735 = vmatprep.mubr.bf16.mxu1 %v2977_v61  ;;  %2764 = vmatpush3.bf16.msra.mxu1 %v3030_v29  ;;  %v3019_v61 = vld [vmem:[%s3859_s0 + $0x2ec] ss:$28 sps:$4 sm:$0xff]  }
  0xa6   :  { %2765 = vmatprep.subr.bf16.mxu1 %v3031_v31 }
  0xa9   :  { %2766 = vmatpush3.bf16.msra.mxu1 %v3031_v31 }
  0xaa   :  { %1544 = vmatmul.mubr.bf16.gmra.mrb[68].mxu0 %v2973_v62  ;;  %2767 = vmatprep.subr.bf16.mxu1 %v3032_v33 }
  0xab   :  { %1551 = vmatprep.mubr.bf16.mxu0 %v2974_v63 }
  0xac   :  { %2736 = vmatmul.mubr.bf16.gmra.mrb[68].mxu1 %v2978_v0 }
  0xad   :  { %2739 = vmatprep.mubr.bf16.mxu1 %v2985_v1  ;;  %2768 = vmatpush3.bf16.msra.mxu1 %v3032_v33 }
  0xae   :  { %2769 = vmatprep.subr.bf16.mxu1 %v3033_v38 }
  0xb1   :  { %2770 = vmatpush3.bf16.msra.mxu1 %v3033_v38 }
  0xb2   :  { %1552 = vmatmul.mubr.bf16.gmra.mrb[72].mxu0 %v2976_v2  ;;  %2771 = vmatprep.subr.bf16.mxu1 %v3034_v49 }
  0xb3   :  { %1559 = vmatprep.mubr.bf16.mxu0 %v2979_v3 }
  0xb4   :  { %2740 = vmatmul.mubr.bf16.gmra.mrb[72].mxu1 %v2986_v4 }
  0xb5   :  { %2743 = vmatprep.mubr.bf16.mxu1 %v2993_v5  ;;  %2772 = vmatpush3.bf16.msra.mxu1 %v3034_v49  ;;  %v3036_v5 = vld [vmem:[%s3862_s3 + $0x30] sm:$0xff]  }
  0xb6   :  { %2773 = vmatprep.subr.bf16.mxu1 %v3035_v58 }
  0xb9   :  { %2774 = vmatpush3.bf16.msra.mxu1 %v3035_v58 }
  0xba   :  { %1560 = vmatmul.mubr.bf16.gmra.mrb[76].mxu0 %v2981_v6  ;;  %2775 = vmatprep.subr.bf16.mxu1 %v3036_v5 }
  0xbb   :  { %1567 = vmatprep.mubr.bf16.mxu0 %v2982_v7 }
  0xbc   :  { %2744 = vmatmul.mubr.bf16.gmra.mrb[76].mxu1 %v2994_v8 }
  0xbd   :  { %2747 = vmatprep.mubr.bf16.mxu1 %v3001_v9  ;;  %2776 = vmatpush3.bf16.msra.mxu1 %v3036_v5 }
  0xc2   :  { %1568 = vmatmul.mubr.bf16.gmra.mrb[80].mxu0 %v2984_v10 }
  0xc3   :  { %1575 = vmatprep.mubr.bf16.mxu0 %v2987_v11 }
  0xc4   :  { %2748 = vmatmul.mubr.bf16.gmra.mrb[80].mxu1 %v3002_v12 }
  0xc5   :  { %2751 = vmatprep.mubr.bf16.mxu1 %v3009_v13  ;;  %v3021_v13 = vld [vmem:[%s3859_s0 + $0x2e8] ss:$28 sps:$4 sm:$0xff]  }
  0xca   :  { %1576 = vmatmul.mubr.bf16.gmra.mrb[84].mxu0 %v2989_v14  ;;  %v3037_v14 = vld [vmem:[%s3862_s3 + $0x38] sm:$0xff]  }
  0xcb   :  { %1583 = vmatprep.mubr.bf16.mxu0 %v2990_v15  ;;  %2777 = vmatprep.subr.bf16.mxu1 %v3037_v14 }
  0xcc   :  { %2752 = vmatmul.mubr.bf16.gmra.mrb[84].mxu1 %v3010_v16 }
  0xcd   :  { %2755 = vmatprep.mubr.bf16.mxu1 %v3017_v17  ;;  %v3022_v17 = vld [vmem:[%s3859_s0 + $0x324] ss:$28 sps:$4 sm:$0xff]   ;;  %2778 = vmatpush3.bf16.msra.mxu1 %v3037_v14 }
  0xd2   :  { %1584 = vmatmul.mubr.bf16.gmra.mrb[88].mxu0 %v2992_v18 }
  0xd3   :  { %1591 = vmatprep.mubr.bf16.mxu0 %v2995_v19 }
  0xd4   :  { %2756 = vmatmul.mubr.bf16.gmra.mrb[88].mxu1 %v3018_v20 }
  0xd5   :  { %2759 = vmatprep.mubr.bf16.mxu1 %v3025_v21 }
  0xda   :  { %1592 = vmatmul.mubr.bf16.gmra.mrb[92].mxu0 %v2997_v22 }
  0xdb   :  { %1599 = vmatprep.mubr.bf16.mxu0 %v2998_v23 }
  0xdc   :  { %2760 = vmatmul.mubr.bf16.gmra.mrb[92].mxu1 %v3026_v24 }
  0xe2   :  { %1600 = vmatmul.mubr.bf16.gmra.mrb[96].mxu0 %v3000_v25 }
  0xe3   :  { %1607 = vmatprep.mubr.bf16.mxu0 %v3003_v26 }
  0xea   :  { %1608 = vmatmul.mubr.bf16.gmra.mrb[100].mxu0 %v3005_v27 }
  0xeb   :  { %1615 = vmatprep.mubr.bf16.mxu0 %v3006_v28 }
  0xf2   :  { %1616 = vmatmul.mubr.bf16.gmra.mrb[104].mxu0 %v3008_v30 }
  0xf3   :  { %1623 = vmatprep.mubr.bf16.mxu0 %v3011_v32  ;;  %v3024_v32 = vld [vmem:[%s3859_s0 + $0x320] ss:$28 sps:$4 sm:$0xff]  }
  0xf5   :  { %v2347_v34 = vpop.f32.mrb[0].mxu0 }
  0xf6   :  { %v2348_v36 = vpop.f32.mrb[1].mxu0 }
  0xf7   :  { %v2349_v39 = vadd.f32 %v2348_v36, %v2347_v34  ;;  %v2350_v40 = vpop.f32.mrb[2].mxu0  ;;  %v2459_v42 = vpop.f32.mrb[0].mxu1  ;;  %v3027_v36 = vld [vmem:[%s3859_s0 + $0x35c] ss:$28 sps:$4 sm:$0xff]  }
  0xf8   :  { %v2351_v43 = vpop.f32.mrb[3].mxu0  ;;  %v2460_v46 = vpop.f32.mrb[1].mxu1 }
  0xf9   :  { %v1216_v44 = vadd.f32 %v2349_v39, %v3584_v35  ;;  %v2352_v45 = vadd.f32 %v2351_v43, %v2350_v40  ;;  %v2461_v47 = vadd.f32 %v2460_v46, %v2459_v42  ;;  %v2462_v48 = vpop.f32.mrb[2].mxu1 }
  0xfa   :  { %1624 = vmatmul.mubr.bf16.gmra.mrb[108].mxu0 %v3013_v37  ;;  %v2463_v51 = vpop.f32.mrb[3].mxu1 }
  0xfb   :  { %v1219_v50 = vadd.f32 %v2352_v45, %v3584_v35  ;;  %1631 = vmatprep.mubr.bf16.mxu0 %v3014_v41  ;;  %v3600_v52 = vadd.f32 %v2461_v47, %v1216_v44  ;;  %v2464_v53 = vadd.f32 %v2463_v51, %v2462_v48  ;;  %v3029_v51 = vld [vmem:[%s3859_s0 + $0x358] ss:$28 sps:$4 sm:$0xff]  }
  0xfd   :  { %v2353_v54 = vpop.f32.mrb[4].mxu0  ;;  %v3602_v55 = vadd.f32 %v2464_v53, %v1219_v50 }
  0xfe   :  { %v2354_v56 = vpop.f32.mrb[5].mxu0 }
  0xff   :  { %v2355_v59 = vadd.f32 %v2354_v56, %v2353_v54  ;;  %v2356_v60 = vpop.f32.mrb[6].mxu0  ;;  %v2465_v62 = vpop.f32.mrb[4].mxu1 }
 0x100   :  { %v2357_v63 = vpop.f32.mrb[7].mxu0  ;;  %v2466_v2 = vpop.f32.mrb[5].mxu1 }
 0x101   :  { %v1224_v0 = vadd.f32 %v2355_v59, %v3584_v35  ;;  %v2358_v1 = vadd.f32 %v2357_v63, %v2356_v60  ;;  %v2467_v3 = vadd.f32 %v2466_v2, %v2465_v62  ;;  %v2468_v4 = vpop.f32.mrb[6].mxu1 }
 0x102   :  { %1632 = vmatmul.mubr.bf16.gmra.mrb[112].mxu0 %v3016_v57  ;;  %v2469_v7 = vpop.f32.mrb[7].mxu1 }
 0x103   :  { %v1227_v6 = vadd.f32 %v2358_v1, %v3584_v35  ;;  %1639 = vmatprep.mubr.bf16.mxu0 %v3019_v61  ;;  %v3618_v8 = vadd.f32 %v2467_v3, %v1224_v0  ;;  %v2470_v9 = vadd.f32 %v2469_v7, %v2468_v4 }
 0x105   :  { %v2359_v10 = vpop.f32.mrb[8].mxu0  ;;  %v3620_v11 = vadd.f32 %v2470_v9, %v1227_v6 }
 0x106   :  { %v2360_v12 = vpop.f32.mrb[9].mxu0 }
 0x107   :  { %v2361_v15 = vadd.f32 %v2360_v12, %v2359_v10  ;;  %v2362_v16 = vpop.f32.mrb[10].mxu0  ;;  %v2471_v18 = vpop.f32.mrb[8].mxu1 }
 0x108   :  { %v2363_v19 = vpop.f32.mrb[11].mxu0  ;;  %v2472_v22 = vpop.f32.mrb[9].mxu1 }
 0x109   :  { %v1232_v20 = vadd.f32 %v2361_v15, %v3584_v35  ;;  %v2364_v21 = vadd.f32 %v2363_v19, %v2362_v16  ;;  %v2473_v23 = vadd.f32 %v2472_v22, %v2471_v18  ;;  %v2474_v24 = vpop.f32.mrb[10].mxu1 }
 0x10a   :  { %1640 = vmatmul.mubr.bf16.gmra.mrb[116].mxu0 %v3021_v13  ;;  %v2475_v26 = vpop.f32.mrb[11].mxu1 }
 0x10b   :  { %v1235_v25 = vadd.f32 %v2364_v21, %v3584_v35  ;;  %1647 = vmatprep.mubr.bf16.mxu0 %v3022_v17  ;;  %v3633_v27 = vadd.f32 %v2473_v23, %v1232_v20  ;;  %v2476_v28 = vadd.f32 %v2475_v26, %v2474_v24 }
 0x10d   :  { %v2365_v29 = vpop.f32.mrb[12].mxu0  ;;  %v3635_v30 = vadd.f32 %v2476_v28, %v1235_v25 }
 0x10e   :  { %v2366_v31 = vpop.f32.mrb[13].mxu0 }
 0x10f   :  { %v2367_v33 = vadd.f32 %v2366_v31, %v2365_v29  ;;  %v2368_v34 = vpop.f32.mrb[14].mxu0  ;;  %v2477_v37 = vpop.f32.mrb[12].mxu1 }
 0x110   :  { %v2369_v38 = vpop.f32.mrb[15].mxu0  ;;  %v2478_v41 = vpop.f32.mrb[13].mxu1 }
 0x111   :  { %v1240_v39 = vadd.f32 %v2367_v33, %v3584_v35  ;;  %v2370_v40 = vadd.f32 %v2369_v38, %v2368_v34  ;;  %v2479_v42 = vadd.f32 %v2478_v41, %v2477_v37  ;;  %v2480_v43 = vpop.f32.mrb[14].mxu1 }
 0x112   :  { %1648 = vmatmul.mubr.bf16.gmra.mrb[120].mxu0 %v3024_v32  ;;  %v2481_v45 = vpop.f32.mrb[15].mxu1 }
 0x113   :  { %v1243_v44 = vadd.f32 %v2370_v40, %v3584_v35  ;;  %1655 = vmatprep.mubr.bf16.mxu0 %v3027_v36  ;;  %v3645_v46 = vadd.f32 %v2479_v42, %v1240_v39  ;;  %v2482_v47 = vadd.f32 %v2481_v45, %v2480_v43 }
 0x115   :  { %v2371_v48 = vpop.f32.mrb[16].mxu0  ;;  %v3647_v49 = vadd.f32 %v2482_v47, %v1243_v44 }
 0x116   :  { %v2372_v50 = vpop.f32.mrb[17].mxu0 }
 0x117   :  { %v2373_v53 = vadd.f32 %v2372_v50, %v2371_v48  ;;  %v2374_v54 = vpop.f32.mrb[18].mxu0  ;;  %v2483_v56 = vpop.f32.mrb[16].mxu1 }
 0x118   :  { %v2375_v57 = vpop.f32.mrb[19].mxu0  ;;  %v2484_v60 = vpop.f32.mrb[17].mxu1 }
 0x119   :  { %v1248_v58 = vadd.f32 %v2373_v53, %v3584_v35  ;;  %v2376_v59 = vadd.f32 %v2375_v57, %v2374_v54  ;;  %v2485_v61 = vadd.f32 %v2484_v60, %v2483_v56  ;;  %v2486_v62 = vpop.f32.mrb[18].mxu1 }
 0x11a   :  { %1656 = vmatmul.mubr.bf16.gmra.mrb[124].mxu0 %v3029_v51  ;;  %v2487_v0 = vpop.f32.mrb[19].mxu1 }
 0x11b   :  { %v1251_v63 = vadd.f32 %v2376_v59, %v3584_v35  ;;  %v3654_v1 = vadd.f32 %v2485_v61, %v1248_v58  ;;  %v2488_v2 = vadd.f32 %v2487_v0, %v2486_v62 }
 0x11d   :  { %v2377_v3 = vpop.f32.mrb[20].mxu0  ;;  %v3656_v4 = vadd.f32 %v2488_v2, %v1251_v63 }
 0x11e   :  { %v2378_v5 = vpop.f32.mrb[21].mxu0 }
 0x11f   :  { %v2379_v6 = vadd.f32 %v2378_v5, %v2377_v3  ;;  %v2380_v7 = vpop.f32.mrb[22].mxu0  ;;  %v2489_v9 = vpop.f32.mrb[20].mxu1 }
 0x120   :  { %v2381_v10 = vpop.f32.mrb[23].mxu0  ;;  %v2490_v14 = vpop.f32.mrb[21].mxu1 }
 0x121   :  { %v1256_v12 = vadd.f32 %v2379_v6, %v3584_v35  ;;  %v2382_v13 = vadd.f32 %v2381_v10, %v2380_v7  ;;  %v2491_v15 = vadd.f32 %v2490_v14, %v2489_v9  ;;  %v2492_v16 = vpop.f32.mrb[22].mxu1 }
 0x122   :  { %v2493_v18 = vpop.f32.mrb[23].mxu1 }
 0x123   :  { %v1259_v17 = vadd.f32 %v2382_v13, %v3584_v35  ;;  %v3660_v19 = vadd.f32 %v2491_v15, %v1256_v12  ;;  %v2494_v20 = vadd.f32 %v2493_v18, %v2492_v16 }
 0x125   :  { %v2383_v21 = vpop.f32.mrb[24].mxu0  ;;  %v3662_v22 = vadd.f32 %v2494_v20, %v1259_v17 }
 0x126   :  { %v2384_v23 = vpop.f32.mrb[25].mxu0 }
 0x127   :  { %v2385_v24 = vadd.f32 %v2384_v23, %v2383_v21  ;;  %v2386_v25 = vpop.f32.mrb[26].mxu0  ;;  %v2495_v26 = vpop.f32.mrb[24].mxu1 }
 0x128   :  { %v2387_v28 = vpop.f32.mrb[27].mxu0  ;;  %v2496_v32 = vpop.f32.mrb[25].mxu1 }
 0x129   :  { %v1264_v29 = vadd.f32 %v2385_v24, %v3584_v35  ;;  %v2388_v31 = vadd.f32 %v2387_v28, %v2386_v25  ;;  %v2497_v33 = vadd.f32 %v2496_v32, %v2495_v26  ;;  %v2498_v34 = vpop.f32.mrb[26].mxu1 }
 0x12a   :  { %v2499_v37 = vpop.f32.mrb[27].mxu1 }
 0x12b   :  { %v1267_v36 = vadd.f32 %v2388_v31, %v3584_v35  ;;  %v3666_v38 = vadd.f32 %v2497_v33, %v1264_v29  ;;  %v2500_v39 = vadd.f32 %v2499_v37, %v2498_v34 }
 0x12d   :  { %v2389_v40 = vpop.f32.mrb[28].mxu0  ;;  %v3668_v41 = vadd.f32 %v2500_v39, %v1267_v36 }
 0x12e   :  { %v2390_v42 = vpop.f32.mrb[29].mxu0 }
 0x12f   :  { %v2391_v43 = vadd.f32 %v2390_v42, %v2389_v40  ;;  %v2392_v44 = vpop.f32.mrb[30].mxu0  ;;  %v2501_v45 = vpop.f32.mrb[28].mxu1 }
 0x130   :  { %v2393_v47 = vpop.f32.mrb[31].mxu0  ;;  %v2502_v51 = vpop.f32.mrb[29].mxu1 }
 0x131   :  { %v1272_v48 = vadd.f32 %v2391_v43, %v3584_v35  ;;  %v2394_v50 = vadd.f32 %v2393_v47, %v2392_v44  ;;  %v2503_v53 = vadd.f32 %v2502_v51, %v2501_v45  ;;  %v2504_v54 = vpop.f32.mrb[30].mxu1 }
 0x132   :  { %v2505_v57 = vpop.f32.mrb[31].mxu1 }
 0x133   :  { %v1275_v56 = vadd.f32 %v2394_v50, %v3584_v35  ;;  %v3672_v58 = vadd.f32 %v2503_v53, %v1272_v48  ;;  %v2506_v59 = vadd.f32 %v2505_v57, %v2504_v54 }
 0x135   :  { %v2395_v60 = vpop.f32.mrb[32].mxu0  ;;  %v3674_v61 = vadd.f32 %v2506_v59, %v1275_v56 }
 0x136   :  { %v2396_v62 = vpop.f32.mrb[33].mxu0 }
 0x137   :  { %v2397_v63 = vadd.f32 %v2396_v62, %v2395_v60  ;;  %v2398_v0 = vpop.f32.mrb[34].mxu0  ;;  %v2507_v2 = vpop.f32.mrb[32].mxu1 }
 0x138   :  { %v2399_v3 = vpop.f32.mrb[35].mxu0  ;;  %v2508_v7 = vpop.f32.mrb[33].mxu1 }
 0x139   :  { %v1280_v5 = vadd.f32 %v2397_v63, %v3584_v35  ;;  %v2400_v6 = vadd.f32 %v2399_v3, %v2398_v0  ;;  %v2509_v9 = vadd.f32 %v2508_v7, %v2507_v2  ;;  %v2510_v10 = vpop.f32.mrb[34].mxu1 }
 0x13a   :  { %v2511_v13 = vpop.f32.mrb[35].mxu1 }
 0x13b   :  { %v1283_v12 = vadd.f32 %v2400_v6, %v3584_v35  ;;  %v3678_v14 = vadd.f32 %v2509_v9, %v1280_v5  ;;  %v2512_v15 = vadd.f32 %v2511_v13, %v2510_v10 }
 0x13d   :  { %v2401_v16 = vpop.f32.mrb[36].mxu0  ;;  %v3680_v17 = vadd.f32 %v2512_v15, %v1283_v12 }
 0x13e   :  { %v2402_v18 = vpop.f32.mrb[37].mxu0 }
 0x13f   :  { %v2403_v20 = vadd.f32 %v2402_v18, %v2401_v16  ;;  %v2404_v21 = vpop.f32.mrb[38].mxu0  ;;  %v2513_v23 = vpop.f32.mrb[36].mxu1 }
 0x140   :  { %v2405_v24 = vpop.f32.mrb[39].mxu0  ;;  %v2514_v28 = vpop.f32.mrb[37].mxu1 }
 0x141   :  { %v1288_v25 = vadd.f32 %v2403_v20, %v3584_v35  ;;  %v2406_v26 = vadd.f32 %v2405_v24, %v2404_v21  ;;  %v2515_v29 = vadd.f32 %v2514_v28, %v2513_v23  ;;  %v2516_v31 = vpop.f32.mrb[38].mxu1 }
 0x142   :  { %v2517_v33 = vpop.f32.mrb[39].mxu1 }
 0x143   :  { %v1291_v32 = vadd.f32 %v2406_v26, %v3584_v35  ;;  %v3684_v34 = vadd.f32 %v2515_v29, %v1288_v25  ;;  %v2518_v36 = vadd.f32 %v2517_v33, %v2516_v31 }
 0x145   :  { %v2407_v37 = vpop.f32.mrb[40].mxu0  ;;  %v3686_v39 = vadd.f32 %v2518_v36, %v1291_v32 }
 0x146   :  { %v2408_v40 = vpop.f32.mrb[41].mxu0 }
 0x147   :  { %v2409_v42 = vadd.f32 %v2408_v40, %v2407_v37  ;;  %v2410_v43 = vpop.f32.mrb[42].mxu0  ;;  %v2519_v44 = vpop.f32.mrb[40].mxu1 }
 0x148   :  { %v2411_v45 = vpop.f32.mrb[43].mxu0  ;;  %v2520_v50 = vpop.f32.mrb[41].mxu1 }
 0x149   :  { %v1296_v47 = vadd.f32 %v2409_v42, %v3584_v35  ;;  %v2412_v48 = vadd.f32 %v2411_v45, %v2410_v43  ;;  %v2521_v51 = vadd.f32 %v2520_v50, %v2519_v44  ;;  %v2522_v53 = vpop.f32.mrb[42].mxu1 }
 0x14a   :  { %v2523_v56 = vpop.f32.mrb[43].mxu1 }
 0x14b   :  { %v1299_v54 = vadd.f32 %v2412_v48, %v3584_v35  ;;  %v3690_v57 = vadd.f32 %v2521_v51, %v1296_v47  ;;  %v2524_v59 = vadd.f32 %v2523_v56, %v2522_v53 }
 0x14d   :  { %v2413_v60 = vpop.f32.mrb[44].mxu0  ;;  %v3692_v62 = vadd.f32 %v2524_v59, %v1299_v54 }
 0x14e   :  { %v2414_v63 = vpop.f32.mrb[45].mxu0 }
 0x14f   :  { %v2415_v0 = vadd.f32 %v2414_v63, %v2413_v60  ;;  %v2416_v2 = vpop.f32.mrb[46].mxu0  ;;  %v2525_v3 = vpop.f32.mrb[44].mxu1 }
 0x150   :  { %v2417_v5 = vpop.f32.mrb[47].mxu0  ;;  %v2526_v9 = vpop.f32.mrb[45].mxu1 }
 0x151   :  { %v1304_v6 = vadd.f32 %v2415_v0, %v3584_v35  ;;  %v2418_v7 = vadd.f32 %v2417_v5, %v2416_v2  ;;  %v2527_v10 = vadd.f32 %v2526_v9, %v2525_v3  ;;  %v2528_v12 = vpop.f32.mrb[46].mxu1 }
 0x152   :  { %v2529_v15 = vpop.f32.mrb[47].mxu1 }
 0x153   :  { %v1307_v13 = vadd.f32 %v2418_v7, %v3584_v35  ;;  %v3696_v16 = vadd.f32 %v2527_v10, %v1304_v6  ;;  %v2530_v18 = vadd.f32 %v2529_v15, %v2528_v12 }
 0x155   :  { %v2419_v20 = vpop.f32.mrb[48].mxu0  ;;  %v3698_v21 = vadd.f32 %v2530_v18, %v1307_v13 }
 0x156   :  { %v2420_v23 = vpop.f32.mrb[49].mxu0 }
 0x157   :  { %v2421_v24 = vadd.f32 %v2420_v23, %v2419_v20  ;;  %v2422_v25 = vpop.f32.mrb[50].mxu0  ;;  %v2531_v26 = vpop.f32.mrb[48].mxu1 }
 0x158   :  { %v2423_v28 = vpop.f32.mrb[51].mxu0  ;;  %v2532_v32 = vpop.f32.mrb[49].mxu1 }
 0x159   :  { %v1312_v29 = vadd.f32 %v2421_v24, %v3584_v35  ;;  %v2424_v31 = vadd.f32 %v2423_v28, %v2422_v25  ;;  %v2533_v33 = vadd.f32 %v2532_v32, %v2531_v26  ;;  %v2534_v36 = vpop.f32.mrb[50].mxu1 }
 0x15a   :  { %v2535_v40 = vpop.f32.mrb[51].mxu1 }
 0x15b   :  { %v1315_v37 = vadd.f32 %v2424_v31, %v3584_v35  ;;  %v3702_v42 = vadd.f32 %v2533_v33, %v1312_v29  ;;  %v2536_v43 = vadd.f32 %v2535_v40, %v2534_v36 }
 0x15d   :  { %v2425_v44 = vpop.f32.mrb[52].mxu0  ;;  %v3704_v45 = vadd.f32 %v2536_v43, %v1315_v37 }
 0x15e   :  { %v2426_v47 = vpop.f32.mrb[53].mxu0 }
 0x15f   :  { %v2427_v48 = vadd.f32 %v2426_v47, %v2425_v44  ;;  %v2428_v50 = vpop.f32.mrb[54].mxu0  ;;  %v2537_v51 = vpop.f32.mrb[52].mxu1 }
 0x160   :  { %v2429_v53 = vpop.f32.mrb[55].mxu0  ;;  %v2538_v59 = vpop.f32.mrb[53].mxu1 }
 0x161   :  { %v1320_v54 = vadd.f32 %v2427_v48, %v3584_v35  ;;  %v2430_v56 = vadd.f32 %v2429_v53, %v2428_v50  ;;  %v2539_v60 = vadd.f32 %v2538_v59, %v2537_v51  ;;  %v2540_v63 = vpop.f32.mrb[54].mxu1 }
 0x162   :  { %v2541_v2 = vpop.f32.mrb[55].mxu1 }
 0x163   :  { %v1323_v0 = vadd.f32 %v2430_v56, %v3584_v35  ;;  %v3708_v3 = vadd.f32 %v2539_v60, %v1320_v54  ;;  %v2542_v5 = vadd.f32 %v2541_v2, %v2540_v63 }
 0x165   :  { %v2431_v6 = vpop.f32.mrb[56].mxu0  ;;  %v3710_v7 = vadd.f32 %v2542_v5, %v1323_v0 }
 0x166   :  { %v2432_v9 = vpop.f32.mrb[57].mxu0 }
 0x167   :  { %v2433_v10 = vadd.f32 %v2432_v9, %v2431_v6  ;;  %v2434_v12 = vpop.f32.mrb[58].mxu0  ;;  %v2543_v13 = vpop.f32.mrb[56].mxu1 }
 0x168   :  { %v2435_v15 = vpop.f32.mrb[59].mxu0  ;;  %v2544_v23 = vpop.f32.mrb[57].mxu1 }
 0x169   :  { %v1328_v18 = vadd.f32 %v2433_v10, %v3584_v35  ;;  %v2436_v20 = vadd.f32 %v2435_v15, %v2434_v12  ;;  %v2545_v24 = vadd.f32 %v2544_v23, %v2543_v13  ;;  %v2546_v25 = vpop.f32.mrb[58].mxu1 }
 0x16a   :  { %v2547_v28 = vpop.f32.mrb[59].mxu1 }
 0x16b   :  { %v1331_v26 = vadd.f32 %v2436_v20, %v3584_v35  ;;  %v3714_v29 = vadd.f32 %v2545_v24, %v1328_v18  ;;  %v2548_v31 = vadd.f32 %v2547_v28, %v2546_v25 }
 0x16d   :  { %v2437_v32 = vpop.f32.mrb[60].mxu0  ;;  %v3716_v33 = vadd.f32 %v2548_v31, %v1331_v26 }
 0x16e   :  { %v2438_v36 = vpop.f32.mrb[61].mxu0 }
 0x16f   :  { %v2439_v37 = vadd.f32 %v2438_v36, %v2437_v32  ;;  %v2440_v40 = vpop.f32.mrb[62].mxu0  ;;  %v2549_v43 = vpop.f32.mrb[60].mxu1 }
 0x170   :  { %v2441_v44 = vpop.f32.mrb[63].mxu0  ;;  %v2550_v50 = vpop.f32.mrb[61].mxu1 }
 0x171   :  { %v1336_v47 = vadd.f32 %v2439_v37, %v3584_v35  ;;  %v2442_v48 = vadd.f32 %v2441_v44, %v2440_v40  ;;  %v2551_v51 = vadd.f32 %v2550_v50, %v2549_v43  ;;  %v2552_v53 = vpop.f32.mrb[62].mxu1 }
 0x172   :  { %v2553_v56 = vpop.f32.mrb[63].mxu1 }
 0x173   :  { %v1339_v54 = vadd.f32 %v2442_v48, %v3584_v35  ;;  %v3720_v59 = vadd.f32 %v2551_v51, %v1336_v47  ;;  %v2554_v60 = vadd.f32 %v2553_v56, %v2552_v53 }
 0x175   :  { %v2571_v63 = vpop.f32.mrb[64].mxu0  ;;  %v3722_v0 = vadd.f32 %v2554_v60, %v1339_v54 }
 0x176   :  { %v2572_v2 = vpop.f32.mrb[65].mxu0 }
 0x177   :  { %v2573_v5 = vadd.f32 %v2572_v2, %v2571_v63  ;;  %v2574_v6 = vpop.f32.mrb[66].mxu0  ;;  %v2733_v10 = vpop.f32.mrb[64].mxu1 }
 0x178   :  { %v2575_v9 = vpop.f32.mrb[67].mxu0  ;;  %v1698_v15 = vpop.f32.mrb[65].mxu1 }
 0x179   :  { %v2576_v12 = vadd.f32 %v2575_v9, %v2574_v6  ;;  %v1538_v13 = vadd.f32 %v2573_v5, %v3600_v52  ;;  %v2734_v18 = vpop.f32.mrb[66].mxu1 }
 0x17a   :  { %v1701_v23 = vpop.f32.mrb[67].mxu1 }
 0x17b   :  { %v1699_v20 = vadd.f32 %v1698_v15, %v1538_v13  ;;  %v1541_v35 = vadd.f32 %v2576_v12, %v3602_v55 }
 0x17d   :  { %v1702_v24 = vadd.f32 %v1701_v23, %v1541_v35  ;;  %v2577_v25 = vpop.f32.mrb[68].mxu0  ;;  %v1825_v28 = vmax.f32 %v1699_v20, 0.0 }
 0x17e   :  { %v2578_v26 = vpop.f32.mrb[69].mxu0 }
 0x17f   :  { %v1826_v31 = vmax.f32 %v1702_v24, 0.0  ;;  %v2579_v32 = vadd.f32 %v2578_v26, %v2577_v25  ;;  %v2580_v36 = vpop.f32.mrb[70].mxu0  ;;  %v2737_v40 = vpop.f32.mrb[68].mxu1 }
 0x180   :  { %v2581_v37 = vpop.f32.mrb[71].mxu0  ;;  %v1714_v52 = vpop.f32.mrb[69].mxu1 }
 0x181   :  { %v1857_v43 = vpack.c.bf16 %v1826_v31, %v1825_v28  ;;  %v1546_v44 = vadd.f32 %v2579_v32, %v3618_v8  ;;  %v2582_v47 = vadd.f32 %v2581_v37, %v2580_v36  ;;  %v2738_v48 = vpop.f32.mrb[70].mxu1 }
 0x182   :  { %v1717_v55 = vpop.f32.mrb[71].mxu1 }
 0x183   :  { %v1707_v50 = vadd.f32 %v2733_v10, %v1546_v44  ;;  %v1549_v51 = vadd.f32 %v2582_v47, %v3620_v11  ;;  %2779 = vmatprep.mubr.bf16.mxu1 %v1857_v43 }
 0x185   :  { %v1710_v53 = vadd.f32 %v2734_v18, %v1549_v51  ;;  %v2583_v54 = vpop.f32.mrb[72].mxu0  ;;  %v1827_v60 = vmax.f32 %v1707_v50, 0.0 }
 0x186   :  { %v2584_v56 = vpop.f32.mrb[73].mxu0 }
 0x187   :  { %v1828_v63 = vmax.f32 %v1710_v53, 0.0  ;;  %v2585_v2 = vadd.f32 %v2584_v56, %v2583_v54  ;;  %v2586_v5 = vpop.f32.mrb[74].mxu0  ;;  %v2741_v9 = vpop.f32.mrb[72].mxu1 }
 0x188   :  { %v2587_v6 = vpop.f32.mrb[75].mxu0  ;;  %v1730_v15 = vpop.f32.mrb[73].mxu1 }
 0x189   :  { %v1858_v12 = vpack.c.bf16 %v1828_v63, %v1827_v60  ;;  %v2588_v13 = vadd.f32 %v2587_v6, %v2586_v5  ;;  %v1554_v8 = vadd.f32 %v2585_v2, %v3633_v27  ;;  %v2742_v20 = vpop.f32.mrb[74].mxu1 }
 0x18a   :  { %v1733_v35 = vpop.f32.mrb[75].mxu1 }
 0x18b   :  { %v1715_v10 = vadd.f32 %v1714_v52, %v1554_v8  ;;  %2780 = vmatmul.mubr.bf16.vlgmr.msra.gmra.mrb[96].mxu1 %v1858_v12  ;;  %v1557_v11 = vadd.f32 %v2588_v13, %v3635_v30 }
 0x18d   :  { %v1718_v18 = vadd.f32 %v1717_v55, %v1557_v11  ;;  %v2589_v23 = vpop.f32.mrb[76].mxu0  ;;  %v1829_v25 = vmax.f32 %v1715_v10, 0.0 }
 0x18e   :  { %v2590_v24 = vpop.f32.mrb[77].mxu0 }
 0x18f   :  { %v1830_v26 = vmax.f32 %v1718_v18, 0.0  ;;  %v2591_v28 = vadd.f32 %v2590_v24, %v2589_v23  ;;  %v2592_v31 = vpop.f32.mrb[78].mxu0  ;;  %v3730_v36 = vpop.f32.mrb[76].mxu1 }
 0x190   :  { %v2593_v32 = vpop.f32.mrb[79].mxu0  ;;  %v1746_v44 = vpop.f32.mrb[77].mxu1 }
 0x191   :  { %v1859_v37 = vpack.c.bf16 %v1830_v26, %v1829_v25  ;;  %v1562_v27 = vadd.f32 %v2591_v28, %v3645_v46  ;;  %v2594_v43 = vadd.f32 %v2593_v32, %v2592_v31  ;;  %v3733_v47 = vpop.f32.mrb[78].mxu1 }
 0x192   :  { %v1749_v50 = vpop.f32.mrb[79].mxu1 }
 0x193   :  { %v1723_v52 = vadd.f32 %v2737_v40, %v1562_v27  ;;  %v1565_v30 = vadd.f32 %v2594_v43, %v3647_v49  ;;  %2783 = vmatprep.mubr.bf16.mxu1 %v1859_v37 }
 0x195   :  { %v1726_v51 = vadd.f32 %v2738_v48, %v1565_v30  ;;  %v2595_v55 = vpop.f32.mrb[80].mxu0  ;;  %v1831_v54 = vmax.f32 %v1723_v52, 0.0 }
 0x196   :  { %v2596_v53 = vpop.f32.mrb[81].mxu0 }
 0x197   :  { %v1832_v56 = vmax.f32 %v1726_v51, 0.0  ;;  %v2597_v60 = vadd.f32 %v2596_v53, %v2595_v55  ;;  %v2598_v63 = vpop.f32.mrb[82].mxu0  ;;  %v3736_v5 = vpop.f32.mrb[80].mxu1 }
 0x198   :  { %v2599_v2 = vpop.f32.mrb[83].mxu0  ;;  %v3739_v13 = vpop.f32.mrb[81].mxu1 }
 0x199   :  { %v2600_v46 = vadd.f32 %v2599_v2, %v2598_v63  ;;  %v1570_v6 = vadd.f32 %v2597_v60, %v3654_v1  ;;  %v1860_v12 = vpack.c.bf16 %v1832_v56, %v1831_v54  ;;  %v3741_v40 = vpop.f32.mrb[82].mxu1 }
 0x19a   :  { %v3744_v8 = vpop.f32.mrb[83].mxu1 }
 0x19b   :  { %v1731_v49 = vadd.f32 %v1730_v15, %v1570_v6  ;;  %2784 = vmatmul.mubr.bf16.gmra.mrb[100].mxu1 %v1860_v12  ;;  %v1573_v48 = vadd.f32 %v2600_v46, %v3656_v4 }
 0x19d   :  { %v1734_v10 = vadd.f32 %v1733_v35, %v1573_v48  ;;  %v2601_v11 = vpop.f32.mrb[84].mxu0  ;;  %v1833_v23 = vmax.f32 %v1731_v49, 0.0 }
 0x19e   :  { %v2602_v18 = vpop.f32.mrb[85].mxu0 }
 0x19f   :  { %v1834_v24 = vmax.f32 %v1734_v10, 0.0  ;;  %v2603_v25 = vadd.f32 %v2602_v18, %v2601_v11  ;;  %v2604_v26 = vpop.f32.mrb[86].mxu0  ;;  %v3746_v1 = vpop.f32.mrb[84].mxu1 }
 0x1a0   :  { %v2605_v28 = vpop.f32.mrb[87].mxu0  ;;  %v3749_v15 = vpop.f32.mrb[85].mxu1 }
 0x1a1   :  { %v1861_v31 = vpack.c.bf16 %v1834_v24, %v1833_v23  ;;  %v1578_v32 = vadd.f32 %v2603_v25, %v3660_v19  ;;  %v2606_v37 = vadd.f32 %v2605_v28, %v2604_v26  ;;  %v3751_v27 = vpop.f32.mrb[86].mxu1 }
 0x1a2   :  { %v3754_v43 = vpop.f32.mrb[87].mxu1 }
 0x1a3   :  { %v1739_v4 = vadd.f32 %v2741_v9, %v1578_v32  ;;  %v1581_v35 = vadd.f32 %v2606_v37, %v3662_v22  ;;  %2787 = vmatprep.mubr.bf16.mxu1 %v1861_v31 }
 0x1a5   :  { %v1742_v52 = vadd.f32 %v2742_v20, %v1581_v35  ;;  %v2607_v30 = vpop.f32.mrb[88].mxu0  ;;  %v1835_v55 = vmax.f32 %v1739_v4, 0.0 }
 0x1a6   :  { %v2608_v51 = vpop.f32.mrb[89].mxu0 }
 0x1a7   :  { %v1836_v53 = vmax.f32 %v1742_v52, 0.0  ;;  %v2609_v54 = vadd.f32 %v2608_v51, %v2607_v30  ;;  %v2610_v56 = vpop.f32.mrb[90].mxu0  ;;  %v3756_v19 = vpop.f32.mrb[88].mxu1 }
 0x1a8   :  { %v2611_v60 = vpop.f32.mrb[91].mxu0  ;;  %v3759_v9 = vpop.f32.mrb[89].mxu1 }
 0x1a9   :  { %v2612_v63 = vadd.f32 %v2611_v60, %v2610_v56  ;;  %v1586_v2 = vadd.f32 %v2609_v54, %v3666_v38  ;;  %v1862_v46 = vpack.c.bf16 %v1836_v53, %v1835_v55  ;;  %v3761_v22 = vpop.f32.mrb[90].mxu1 }
 0x1aa   :  { %v3764_v12 = vpop.f32.mrb[91].mxu1 }
 0x1ab   :  { %v1747_v6 = vadd.f32 %v1746_v44, %v1586_v2  ;;  %2788 = vmatmul.mubr.bf16.gmra.mrb[104].mxu1 %v1862_v46  ;;  %v1589_v20 = vadd.f32 %v2612_v63, %v3668_v41 }
 0x1ad   :  { %v1750_v49 = vadd.f32 %v1749_v50, %v1589_v20  ;;  %v2613_v48 = vpop.f32.mrb[92].mxu0  ;;  %v1837_v11 = vmax.f32 %v1747_v6, 0.0 }
 0x1ae   :  { %v2614_v10 = vpop.f32.mrb[93].mxu0 }
 0x1af   :  { %v1838_v18 = vmax.f32 %v1750_v49, 0.0  ;;  %v2615_v23 = vadd.f32 %v2614_v10, %v2613_v48  ;;  %v2616_v24 = vpop.f32.mrb[94].mxu0  ;;  %v3766_v38 = vpop.f32.mrb[92].mxu1 }
 0x1b0   :  { %v2617_v25 = vpop.f32.mrb[95].mxu0  ;;  %v3769_v44 = vpop.f32.mrb[93].mxu1 }
 0x1b1   :  { %v1863_v26 = vpack.c.bf16 %v1838_v18, %v1837_v11  ;;  %v1594_v28 = vadd.f32 %v2615_v23, %v3672_v58  ;;  %v2618_v31 = vadd.f32 %v2617_v25, %v2616_v24  ;;  %v3771_v32 = vpop.f32.mrb[94].mxu1 }
 0x1b2   :  { %v3775_v37 = vpop.f32.mrb[95].mxu1 }
 0x1b3   :  { %v1755_v41 = vadd.f32 %v3730_v36, %v1594_v28  ;;  %v1597_v50 = vadd.f32 %v2618_v31, %v3674_v61  ;;  %2791 = vmatprep.mubr.bf16.mxu1 %v1863_v26 }
 0x1b5   :  { %v1758_v4 = vadd.f32 %v3733_v47, %v1597_v50  ;;  %v2619_v35 = vpop.f32.mrb[96].mxu0  ;;  %v1839_v30 = vmax.f32 %v1755_v41, 0.0 }
 0x1b6   :  { %v2620_v52 = vpop.f32.mrb[97].mxu0 }
 0x1b7   :  { %v1840_v51 = vmax.f32 %v1758_v4, 0.0  ;;  %v2621_v55 = vadd.f32 %v2620_v52, %v2619_v35  ;;  %v2622_v58 = vpop.f32.mrb[98].mxu0 }
 0x1b8   :  { %v2623_v53 = vpop.f32.mrb[99].mxu0 }
 0x1b9   :  { %v2624_v54 = vadd.f32 %v2623_v53, %v2622_v58  ;;  %v1602_v56 = vadd.f32 %v2621_v55, %v3678_v14  ;;  %v1864_v60 = vpack.c.bf16 %v1840_v51, %v1839_v30 }
 0x1bb   :  { %v1763_v36 = vadd.f32 %v3739_v13, %v1602_v56  ;;  %2792 = vmatmul.mubr.bf16.gmra.mrb[108].mxu1 %v1864_v60  ;;  %v1605_v61 = vadd.f32 %v2624_v54, %v3680_v17 }
 0x1bd   :  { %v1766_v63 = vadd.f32 %v3744_v8, %v1605_v61  ;;  %v2625_v2 = vpop.f32.mrb[100].mxu0  ;;  %v1841_v46 = vmax.f32 %v1763_v36, 0.0 }
 0x1be   :  { %v2626_v47 = vpop.f32.mrb[101].mxu0 }
 0x1bf   :  { %v1842_v6 = vmax.f32 %v1766_v63, 0.0  ;;  %v2627_v20 = vadd.f32 %v2626_v47, %v2625_v2  ;;  %v2628_v49 = vpop.f32.mrb[102].mxu0 }
 0x1c0   :  { %v2629_v48 = vpop.f32.mrb[103].mxu0 }
 0x1c1   :  { %v1865_v10 = vpack.c.bf16 %v1842_v6, %v1841_v46  ;;  %v1610_v11 = vadd.f32 %v2627_v20, %v3684_v34  ;;  %v2630_v18 = vadd.f32 %v2629_v48, %v2628_v49 }
 0x1c3   :  { %v1771_v14 = vadd.f32 %v3736_v5, %v1610_v11  ;;  %v1613_v13 = vadd.f32 %v2630_v18, %v3686_v39  ;;  %2795 = vmatprep.mubr.bf16.mxu1 %v1865_v10 }
 0x1c5   :  { %v1774_v17 = vadd.f32 %v3741_v40, %v1613_v13  ;;  %v2631_v23 = vpop.f32.mrb[104].mxu0  ;;  %v1843_v24 = vmax.f32 %v1771_v14, 0.0 }
 0x1c6   :  { %v2632_v8 = vpop.f32.mrb[105].mxu0 }
 0x1c7   :  { %v1844_v25 = vmax.f32 %v1774_v17, 0.0  ;;  %v2633_v26 = vadd.f32 %v2632_v8, %v2631_v23  ;;  %v2634_v28 = vpop.f32.mrb[106].mxu0 }
 0x1c8   :  { %v2635_v31 = vpop.f32.mrb[107].mxu0 }
 0x1c9   :  { %v2636_v41 = vadd.f32 %v2635_v31, %v2634_v28  ;;  %v1618_v50 = vadd.f32 %v2633_v26, %v3690_v57  ;;  %v1866_v4 = vpack.c.bf16 %v1844_v25, %v1843_v24 }
 0x1cb   :  { %v1779_v34 = vadd.f32 %v3749_v15, %v1618_v50  ;;  %2796 = vmatmul.mubr.bf16.gmra.mrb[112].mxu1 %v1866_v4  ;;  %v1621_v5 = vadd.f32 %v2636_v41, %v3692_v62 }
 0x1cd   :  { %v1782_v39 = vadd.f32 %v3754_v43, %v1621_v5  ;;  %v2637_v35 = vpop.f32.mrb[108].mxu0  ;;  %v1845_v52 = vmax.f32 %v1779_v34, 0.0 }
 0x1ce   :  { %v2638_v40 = vpop.f32.mrb[109].mxu0 }
 0x1cf   :  { %v1846_v30 = vmax.f32 %v1782_v39, 0.0  ;;  %v2639_v51 = vadd.f32 %v2638_v40, %v2637_v35  ;;  %v2640_v55 = vpop.f32.mrb[110].mxu0 }
 0x1d0   :  { %v2641_v58 = vpop.f32.mrb[111].mxu0 }
 0x1d1   :  { %v1867_v53 = vpack.c.bf16 %v1846_v30, %v1845_v52  ;;  %v1626_v54 = vadd.f32 %v2639_v51, %v3696_v16  ;;  %v2642_v56 = vadd.f32 %v2641_v58, %v2640_v55 }
 0x1d3   :  { %v1787_v57 = vadd.f32 %v3746_v1, %v1626_v54  ;;  %v1629_v15 = vadd.f32 %v2642_v56, %v3698_v21  ;;  %2799 = vmatprep.mubr.bf16.mxu1 %v1867_v53  ;;  %v3813_v54 = vld [vmem:[%s3863_s4] ss:$0 sm:$0xff]  ;;  %s3062_s4 = smov [#allocation2]  }
 0x1d4   :  { %s2142_s14 = sshll.u32 %s3062_s4, 4  ;;  %s2143_s14 = int_to_ptr.vmem [resolvable:$true] %s2142_s14 }
 0x1d5   :  { %v1790_v62 = vadd.f32 %v3751_v27, %v1629_v15  ;;  %v2643_v60 = vpop.f32.mrb[112].mxu0  ;;  %v1847_v36 = vmax.f32 %v1787_v57, 0.0  ;;  %s3038_s15 = scalar_lea.vmem %s2143_s14, 4096  ;;  %p3043_p1 = scmp.lt.s32.totalorder %s2143_s14, %s2143_s14 }
 0x1d6   :  { %v2644_v43 = vpop.f32.mrb[113].mxu0  ;;  %p3039_p0 = scmp.ne.s32.totalorder %s2143_s14, %s3038_s15  ;;  %p3044_p2 = scmp.lt.s32.totalorder %s3038_s15, %s3038_s15 }
 0x1d7   :  { %v1848_v61 = vmax.f32 %v1790_v62, 0.0  ;;  %v2645_v63 = vadd.f32 %v2644_v43, %v2643_v60  ;;  %v2646_v2 = vpop.f32.mrb[114].mxu0 }
 0x1d8   :  { %v2647_v47 = vpop.f32.mrb[115].mxu0  ;;  %p3045_p3 = por %p3044_p2, %p3043_p1 }
 0x1d9   :  { %v2648_v46 = vadd.f32 %v2647_v47, %v2646_v2  ;;  %v1634_v6 = vadd.f32 %v2645_v63, %v3702_v42  ;;  %v1868_v20 = vpack.c.bf16 %v1848_v61, %v1847_v36 }
 0x1da   :  { %p3046_p4 = pnand %p3045_p3, %p3039_p0 }
 0x1db   :  { %v1795_v16 = vadd.f32 %v3759_v9, %v1634_v6  ;;  %2800 = vmatmul.mubr.bf16.gmra.mrb[116].mxu1 %v1868_v20  ;;  %v1637_v1 = vadd.f32 %v2648_v46, %v3704_v45 }
 0x1dd   :  { %v1798_v21 = vadd.f32 %v3764_v12, %v1637_v1  ;;  %v2649_v49 = vpop.f32.mrb[116].mxu0  ;;  %v1849_v48 = vmax.f32 %v1795_v16, 0.0 }
 0x1de   :  { %v2650_v27 = vpop.f32.mrb[117].mxu0 }
 0x1df   :  { %v1850_v10 = vmax.f32 %v1798_v21, 0.0  ;;  %v2651_v11 = vadd.f32 %v2650_v27, %v2649_v49  ;;  %v2652_v18 = vpop.f32.mrb[118].mxu0 }
 0x1e0   :  { %v2653_v14 = vpop.f32.mrb[119].mxu0 }
 0x1e1   :  { %v1869_v13 = vpack.c.bf16 %v1850_v10, %v1849_v48  ;;  %v1642_v17 = vadd.f32 %v2651_v11, %v3708_v3  ;;  %v2654_v23 = vadd.f32 %v2653_v14, %v2652_v18 }
 0x1e3   :  { %v1803_v42 = vadd.f32 %v3756_v19, %v1642_v17  ;;  %v1645_v9 = vadd.f32 %v2654_v23, %v3710_v7  ;;  %2803 = vmatprep.mubr.bf16.mxu1 %v1869_v13 }
 0x1e5   :  { %v1806_v45 = vadd.f32 %v3761_v22, %v1645_v9  ;;  %v2655_v8 = vpop.f32.mrb[120].mxu0  ;;  %v1851_v24 = vmax.f32 %v1803_v42, 0.0 }
 0x1e6   :  { %v2656_v12 = vpop.f32.mrb[121].mxu0 }
 0x1e7   :  { %v1852_v25 = vmax.f32 %v1806_v45, 0.0  ;;  %v2657_v26 = vadd.f32 %v2656_v12, %v2655_v8  ;;  %v2658_v28 = vpop.f32.mrb[122].mxu0 }
 0x1e8   :  { %v2659_v31 = vpop.f32.mrb[123].mxu0 }
 0x1e9   :  { %v2660_v41 = vadd.f32 %v2659_v31, %v2658_v28  ;;  %v1650_v50 = vadd.f32 %v2657_v26, %v3714_v29  ;;  %v1870_v4 = vpack.c.bf16 %v1852_v25, %v1851_v24 }
 0x1eb   :  { %v1811_v3 = vadd.f32 %v3769_v44, %v1650_v50  ;;  %2804 = vmatmul.mubr.bf16.gmra.mrb[120].mxu1 %v1870_v4  ;;  %v1653_v19 = vadd.f32 %v2660_v41, %v3716_v33 }
 0x1ed   :  { %v1814_v7 = vadd.f32 %v3775_v37, %v1653_v19  ;;  %v2661_v34 = vpop.f32.mrb[124].mxu0  ;;  %v1853_v5 = vmax.f32 %v1811_v3, 0.0 }
 0x1ee   :  { %v2662_v22 = vpop.f32.mrb[125].mxu0 }
 0x1ef   :  { %v1854_v39 = vmax.f32 %v1814_v7, 0.0  ;;  %v2663_v35 = vadd.f32 %v2662_v22, %v2661_v34  ;;  %v2664_v40 = vpop.f32.mrb[126].mxu0 }
 0x1f0   :  { %v2665_v52 = vpop.f32.mrb[127].mxu0 }
 0x1f1   :  { %v1871_v30 = vpack.c.bf16 %v1854_v39, %v1853_v5  ;;  %v1658_v51 = vadd.f32 %v2663_v35, %v3720_v59  ;;  %v2666_v55 = vadd.f32 %v2665_v52, %v2664_v40 }
 0x1f3   :  { %v1819_v29 = vadd.f32 %v3766_v38, %v1658_v51  ;;  %v1661_v44 = vadd.f32 %v2666_v55, %v3722_v0  ;;  %2807 = vmatprep.mubr.bf16.mxu1 %v1871_v30 }
 0x1f5   :  { %v1822_v33 = vadd.f32 %v3771_v32, %v1661_v44  ;;  %v1855_v58 = vmax.f32 %v1819_v29, 0.0 }
 0x1f7   :  { %v1856_v37 = vmax.f32 %v1822_v33, 0.0 }
 0x1f9   :  { %v1872_v53 = vpack.c.bf16 %v1856_v37, %v1855_v58 }
 0x1fb   :  { %2808 = vmatmul.mubr.bf16.gmra.mrb[124].mxu1 %v1872_v53 }
 0x25e   :  { %v2781_v56 = vpop.f32.mrb[96].mxu1 }
 0x25f   :  { %v1987_v59 = vadd.f32 %v2781_v56, %v3813_v54  ;;  %v1978_v57 = vpop.f32.mrb[97].mxu1 }
 0x260   :  { %v1979_v38 = vadd.f32 %v3813_v54, %v1978_v57  ;;  %v2782_v15 = vpop.f32.mrb[98].mxu1 }
 0x261   :  { %2107 = vst [vmem:[#allocation2 + $0x10] sm:$0xff] %v1987_v59  ;;  %v1990_v0 = vadd.f32 %v2782_v15, %v3813_v54  ;;  %v1981_v32 = vpop.f32.mrb[99].mxu1 }
 0x262   :  { %2105 = vst [vmem:[#allocation2] sm:$0xff] %v1979_v38  ;;  %v1982_v62 = vadd.f32 %v3813_v54, %v1981_v32 }
 0x263   :  { %2108 = vst [vmem:[#allocation2 + $0x18] sm:$0xff] %v1990_v0 }
 0x264   :  { %2106 = vst [vmem:[#allocation2 + $0x8] sm:$0xff] %v1982_v62 }
 0x26e   :  { %v2785_v60 = vpop.f32.mrb[100].mxu1 }
 0x26f   :  { %v2003_v43 = vadd.f32 %v2785_v60, %v3813_v54  ;;  %v1994_v36 = vpop.f32.mrb[101].mxu1 }
 0x270   :  { %v1995_v61 = vadd.f32 %v3813_v54, %v1994_v36  ;;  %v2786_v63 = vpop.f32.mrb[102].mxu1 }
 0x271   :  { %2111 = vst [vmem:[#allocation2 + $0x30] sm:$0xff] %v2003_v43  ;;  %v2006_v2 = vadd.f32 %v2786_v63, %v3813_v54  ;;  %v1997_v47 = vpop.f32.mrb[103].mxu1 }
 0x272   :  { %2109 = vst [vmem:[#allocation2 + $0x20] sm:$0xff] %v1995_v61  ;;  %v1998_v46 = vadd.f32 %v3813_v54, %v1997_v47 }
 0x273   :  { %2112 = vst [vmem:[#allocation2 + $0x38] sm:$0xff] %v2006_v2 }
 0x274   :  { %2110 = vst [vmem:[#allocation2 + $0x28] sm:$0xff] %v1998_v46 }
 0x27e   :  { %v2789_v6 = vpop.f32.mrb[104].mxu1 }
 0x27f   :  { %v2019_v20 = vadd.f32 %v2789_v6, %v3813_v54  ;;  %v2010_v16 = vpop.f32.mrb[105].mxu1 }
 0x280   :  { %v2011_v1 = vadd.f32 %v3813_v54, %v2010_v16  ;;  %v2790_v21 = vpop.f32.mrb[106].mxu1 }
 0x281   :  { %2115 = vst [vmem:[#allocation2 + $0x50] sm:$0xff] %v2019_v20  ;;  %v2022_v49 = vadd.f32 %v2790_v21, %v3813_v54  ;;  %v2013_v27 = vpop.f32.mrb[107].mxu1 }
 0x282   :  { %2113 = vst [vmem:[#allocation2 + $0x40] sm:$0xff] %v2011_v1  ;;  %v2014_v48 = vadd.f32 %v3813_v54, %v2013_v27 }
 0x283   :  { %2116 = vst [vmem:[#allocation2 + $0x58] sm:$0xff] %v2022_v49 }
 0x284   :  { %2114 = vst [vmem:[#allocation2 + $0x48] sm:$0xff] %v2014_v48 }
 0x28e   :  { %v2793_v10 = vpop.f32.mrb[108].mxu1 }
 0x28f   :  { %v2035_v11 = vadd.f32 %v2793_v10, %v3813_v54  ;;  %v2026_v18 = vpop.f32.mrb[109].mxu1 }
 0x290   :  { %v2027_v14 = vadd.f32 %v3813_v54, %v2026_v18  ;;  %v2794_v13 = vpop.f32.mrb[110].mxu1 }
 0x291   :  { %2119 = vst [vmem:[#allocation2 + $0x70] sm:$0xff] %v2035_v11  ;;  %v2038_v17 = vadd.f32 %v2794_v13, %v3813_v54  ;;  %v2029_v23 = vpop.f32.mrb[111].mxu1 }
 0x292   :  { %2117 = vst [vmem:[#allocation2 + $0x60] sm:$0xff] %v2027_v14  ;;  %v2030_v42 = vadd.f32 %v3813_v54, %v2029_v23 }
 0x293   :  { %2120 = vst [vmem:[#allocation2 + $0x78] sm:$0xff] %v2038_v17 }
 0x294   :  { %2118 = vst [vmem:[#allocation2 + $0x68] sm:$0xff] %v2030_v42 }
 0x29e   :  { %v2797_v9 = vpop.f32.mrb[112].mxu1 }
 0x29f   :  { %v2051_v45 = vadd.f32 %v2797_v9, %v3813_v54  ;;  %v2042_v8 = vpop.f32.mrb[113].mxu1 }
 0x2a0   :  { %v2043_v12 = vadd.f32 %v3813_v54, %v2042_v8  ;;  %v2798_v24 = vpop.f32.mrb[114].mxu1 }
 0x2a1   :  { %2123 = vst [vmem:[#allocation2 + $0x90] sm:$0xff] %v2051_v45  ;;  %v2054_v25 = vadd.f32 %v2798_v24, %v3813_v54  ;;  %v2045_v26 = vpop.f32.mrb[115].mxu1 }
 0x2a2   :  { %2121 = vst [vmem:[#allocation2 + $0x80] sm:$0xff] %v2043_v12  ;;  %v2046_v28 = vadd.f32 %v3813_v54, %v2045_v26 }
 0x2a3   :  { %2124 = vst [vmem:[#allocation2 + $0x98] sm:$0xff] %v2054_v25 }
 0x2a4   :  { %2122 = vst [vmem:[#allocation2 + $0x88] sm:$0xff] %v2046_v28 }
 0x2ae   :  { %v2801_v31 = vpop.f32.mrb[116].mxu1 }
 0x2af   :  { %v2067_v41 = vadd.f32 %v2801_v31, %v3813_v54  ;;  %v2058_v50 = vpop.f32.mrb[117].mxu1 }
 0x2b0   :  { %v2059_v4 = vadd.f32 %v3813_v54, %v2058_v50  ;;  %v2802_v3 = vpop.f32.mrb[118].mxu1 }
 0x2b1   :  { %2127 = vst [vmem:[#allocation2 + $0xb0] sm:$0xff] %v2067_v41  ;;  %v2070_v19 = vadd.f32 %v2802_v3, %v3813_v54  ;;  %v2061_v7 = vpop.f32.mrb[119].mxu1 }
 0x2b2   :  { %2125 = vst [vmem:[#allocation2 + $0xa0] sm:$0xff] %v2059_v4  ;;  %v2062_v34 = vadd.f32 %v3813_v54, %v2061_v7 }
 0x2b3   :  { %2128 = vst [vmem:[#allocation2 + $0xb8] sm:$0xff] %v2070_v19 }
 0x2b4   :  { %2126 = vst [vmem:[#allocation2 + $0xa8] sm:$0xff] %v2062_v34 }
 0x2be   :  { %v2805_v22 = vpop.f32.mrb[120].mxu1 }
 0x2bf   :  { %v2083_v5 = vadd.f32 %v2805_v22, %v3813_v54  ;;  %v2074_v39 = vpop.f32.mrb[121].mxu1 }
 0x2c0   :  { %v2075_v35 = vadd.f32 %v3813_v54, %v2074_v39  ;;  %v2806_v40 = vpop.f32.mrb[122].mxu1 }
 0x2c1   :  { %2131 = vst [vmem:[#allocation2 + $0xd0] sm:$0xff] %v2083_v5  ;;  %v2086_v52 = vadd.f32 %v2806_v40, %v3813_v54  ;;  %v2077_v30 = vpop.f32.mrb[123].mxu1 }
 0x2c2   :  { %2129 = vst [vmem:[#allocation2 + $0xc0] sm:$0xff] %v2075_v35  ;;  %v2078_v51 = vadd.f32 %v3813_v54, %v2077_v30 }
 0x2c3   :  { %2132 = vst [vmem:[#allocation2 + $0xd8] sm:$0xff] %v2086_v52 }
 0x2c4   :  { %2130 = vst [vmem:[#allocation2 + $0xc8] sm:$0xff] %v2078_v51 }
 0x2ce   :  { %v2809_v55 = vpop.f32.mrb[124].mxu1 }
 0x2cf   :  { %v2099_v29 = vadd.f32 %v2809_v55, %v3813_v54  ;;  %v2090_v44 = vpop.f32.mrb[125].mxu1 }
 0x2d0   :  { %v2091_v33 = vadd.f32 %v3813_v54, %v2090_v44  ;;  %v2810_v58 = vpop.f32.mrb[126].mxu1 }
 0x2d1   :  { %2135 = vst [vmem:[#allocation2 + $0xf0] sm:$0xff] %v2099_v29  ;;  %v2102_v37 = vadd.f32 %v2810_v58, %v3813_v54  ;;  %v2093_v53 = vpop.f32.mrb[127].mxu1 }
 0x2d2   :  { %2133 = vst [vmem:[#allocation2 + $0xe0] sm:$0xff] %v2091_v33  ;;  %v2094_v56 = vadd.f32 %v3813_v54, %v2093_v53 }
 0x2d3   :  { %2136 = vst [vmem:[#allocation2 + $0xf8] sm:$0xff] %v2102_v37 }
 0x2d4   :  { %2134 = vst [vmem:[#allocation2 + $0xe8] sm:$0xff] %v2094_v56 }
 0x2d5   :  { %3049 = shalt.err (!%p3046_p4)
}
 0x2d6   :  { %s3050_s18 = scalar_lea.hbm %s3864_s5, 4096 }
 0x2d7   :  { %p3051_p5 = scmp.ne.s32.totalorder %s3864_s5, %s3050_s18  ;;  %p3054_p6 = scmp.lt.u32.totalorder %s3050_s18, %s3864_s5 }
 0x2d9   :  { %p3056_p7 = pnand %p3054_p6, %p3051_p5 }
 0x2db   :  { %3059 = shalt.err (!%p3056_p7)
}
 0x2dc   :  { %s3063_s22 = smov 128   ;;  %s3064_s23 = smov 8  }
 0x2dd   :  { %2148 = dma.vmem_to_hbm [thread:$0]  %s2143_s14, 4096, %s3864_s5, [#allocation3], %s3063_s22, %s3063_s22, %s3064_s23  }
 0x2de   :  { %3060 = dma.done.wait [#allocation3], 4096  }
 0x2df   :  { %3061 = vsyncadd [#allocation3], 4294963200 }
 0x2e0   :  { %2152 = vsyncpa [#allocation3], 1 }

</bundles_post_ra>
